<compile_context>
chip_gen: v5e
topology: v5e:2x2
jax: 0.10.0
libtpu: 0.0.40
codegen_flags: <defaults>
</compile_context>

<pallas_src>
import functools

import jax
import jax.numpy as jnp
from jax.experimental import pallas as pl
from jax.experimental.pallas import tpu as pltpu

# ----------------------------- configuration --------------------------------
MPNN_STEPS = 2
RES_CONN = True
USE_LAYER_NORM = True
USE_NEWEST_EDGES = True
UPDATE_EDGES_AT_END_ONLY = False
DIM_H = 32


# ------------------------------ Pallas kernel --------------------------------
def mpnn_kernel(nodes_ref, edges_ref, nmask_ref, emask_ref,
                w_h5_ref, w_m3_ref, w3we_ref, uh_ref, b_ref,
                out_nodes_ref, out_edges_ref,
                *, nb, n, h, mpnn_steps, res_conn, use_layer_norm,
                use_newest_edges, update_edges_at_end_only):
    H = h
    BN = nb * n
    BNN = nb * n * n
    bf16, f32 = jnp.bfloat16, jnp.float32

    h_nodes = nodes_ref[...].astype(f32)          # [BN,  H]
    e_cur = edges_ref[...].astype(f32)            # [BNN, H]
    nmask = nmask_ref[...]                        # [BN,  1] (compact; broadcast at use)
    emask = emask_ref[...]                        # [BNN, 1] (compact; broadcast at use)
    nmask_snd = nmask.reshape(nb, 1, n, 1)        # sender-node mask view

    W_h5 = w_h5_ref[...]                          # [H, 5H] bf16 = [W1|W2|W_n|Uz|Ur]
    W_m3 = w_m3_ref[...]                          # [H, 3H] bf16 = [Wz|Wr|Wh]
    W3WE = w3we_ref[...]                          # [H, 2H] bf16 = [W3|W_e]
    Uh = uh_ref[...]                              # [H, H]  bf16 (GRU candidate, (r*h) term)

    b_m, bz, br, bh = b_ref[0], b_ref[1], b_ref[2], b_ref[3]
    b_e, ln_g, ln_b = b_ref[4], b_ref[5], b_ref[6]

    old_h, old_e = h_nodes, e_cur   # res_conn adds the ORIGINAL tensors every step

    # Prime the fused edge transform e @ [W3|W_e]: one MXU pass over the initial
    # edge block gives step-0's edge-update term and (by linearity) the residual
    # contribution reused at every later step.
    combo0 = jnp.dot(e_cur.astype(bf16), W3WE, preferred_element_type=f32)   # [BNN,2H]
    eh_cur = combo0[:, 0:H]
    eh_old = eh_cur
    track_emsg = (not use_newest_edges) or update_edges_at_end_only
    if track_emsg:
        emsg_cur = combo0[:, H:2 * H]
        emsg_old = emsg_cur

    h_bf = h_nodes.astype(bf16)     # cast once per node state, reused by all dots

    for step in range(mpnn_steps):
        last = step == mpnn_steps - 1
        update_now = (not update_edges_at_end_only) or last
        use_new_for_msg = update_now and use_newest_edges
        need_next = not last

        # One fused matmul for every linear transform of the current node state.
        fused = jnp.dot(h_bf, W_h5, preferred_element_type=f32)  # [BN,5H]
        hi = fused[:, 0:H] + b_e           # dst-node term of edge update (b_e folded)
        hj = fused[:, H:2 * H]             # src-node term of edge update
        nh = fused[:, 2 * H:3 * H] + b_m   # sender-node term of message (b_m folded)
        hz = fused[:, 3 * H:4 * H]         # GRU z gate, h term
        hr = fused[:, 4 * H:5 * H]         # GRU r gate, h term

        # ---------------- edge update (update_edges) -------------------------
        if update_now:
            pre = (eh_cur.reshape(nb, n, n, H)
                   + hi.reshape(nb, n, 1, H)
                   + hj.reshape(nb, 1, n, H))
            new_e_raw = jax.nn.relu(pre).reshape(BNN, H) * emask   # edge_mask (lane bcast)
        else:
            new_e_raw = e_cur          # literal reference: new_edges = edges

        # Fused [W3|W_e] transform of the fresh edge state: one MXU pass gives
        # this step's message term AND next step's edge-update term.
        if update_now and (use_new_for_msg or need_next):
            combo_new = jnp.dot(new_e_raw.astype(bf16), W3WE,
                                preferred_element_type=f32)        # [BNN,2H]
            eh_new = combo_new[:, 0:H]
            emsg_new = combo_new[:, H:2 * H]

        emsg = emsg_new if use_new_for_msg else emsg_cur

        # ---------------- node update (messages + GRU) -----------------------
        msg = jax.nn.relu(emsg.reshape(nb, n, n, H) + nh.reshape(nb, 1, n, H))
        msg = msg * nmask_snd                                  # mask sender j (bcast here)
        m = jnp.sum(msg, axis=2).reshape(BN, H)                # sum over senders

        gru = jnp.dot(m.astype(bf16), W_m3, preferred_element_type=f32)  # [BN,3H]
        z = jax.nn.sigmoid(gru[:, 0:H] + hz + bz)
        r = jax.nn.sigmoid(gru[:, H:2 * H] + hr + br)
        hh = jnp.dot((r * h_nodes).astype(bf16), Uh, preferred_element_type=f32)
        htil = jnp.tanh(gru[:, 2 * H:3 * H] + hh + bh)
        new_h = (1.0 - z) * htil + z * h_nodes      # torch.nn.GRUCell convention

        if use_layer_norm:
            mu = jnp.mean(new_h, axis=-1, keepdims=True)
            var = jnp.mean((new_h - mu) ** 2, axis=-1, keepdims=True)
            new_h = (new_h - mu) * jax.lax.rsqrt(var + 1e-5) * ln_g + ln_b

        new_h = new_h * nmask                                  # node_mask ([BN,1] bcast)

        if res_conn:
            new_h = new_h + old_h

        # ------------- carry states (edge residual via matmul linearity) -----
        if update_now:
            e_next = (new_e_raw + old_e) if res_conn else new_e_raw
        else:
            e_next = (e_cur + old_e) if res_conn else e_cur
        if need_next:
            if update_now:
                eh_cur = (eh_new + eh_old) if res_conn else eh_new
                if track_emsg:
                    emsg_cur = (emsg_new + emsg_old) if res_conn else emsg_new
            else:
                eh_cur = (eh_cur + eh_old) if res_conn else eh_cur
                if track_emsg:
                    emsg_cur = (emsg_cur + emsg_old) if res_conn else emsg_cur

        h_nodes = new_h
        h_bf = new_h.astype(bf16)
        e_cur = e_next

    out_nodes_ref[...] = h_nodes.astype(out_nodes_ref.dtype)
    out_edges_ref[...] = e_cur.astype(out_edges_ref.dtype)


# ------------------------------ wrapper --------------------------------------
def _pick_graphs_per_block(batch, n, h, target_edge_block_bytes=1 << 20):
    """Largest per-block graph count whose f32 edge slab stays <= ~1 MiB while
    keeping >=2 (ideally >=4) grid steps for pipelining / v7x megacore use."""
    per_graph = n * n * h * 4
    divisors = [g for g in range(1, batch + 1) if batch % g == 0]
    fitting = [g for g in divisors if g * per_graph <= target_edge_block_bytes] or [1]
    for min_blocks in (4, 2, 1):
        cands = [g for g in fitting if batch // g >= min_blocks]
        if cands:
            return max(cands)
    return 1


def mpnn_forward(nodes, edges, node_mask, edge_mask, params, *,
                 graphs_per_block=None):
    """nodes [B,N,H], edges [B,N,N,H], node_mask [B,N], edge_mask [B,N,N]."""
    B, N, H = nodes.shape
    if graphs_per_block is None:
        graphs_per_block = _pick_graphs_per_block(B, N, H)
    assert B % graphs_per_block == 0
    nblk = B // graphs_per_block
    BN_blk = graphs_per_block * N
    BNN_blk = graphs_per_block * N * N

    # Flat, matmul-ready views; masks stay COMPACT (broadcast inside the kernel).
    nodes_f = nodes.reshape(B * N, H)
    edges_f = edges.reshape(B * N * N, H)
    nmask_f = node_mask.reshape(B * N, 1).astype(jnp.float32)
    emask_f = edge_mask.reshape(B * N * N, 1).astype(jnp.float32)

    bf16 = jnp.bfloat16
    W_h5 = jnp.concatenate([params['W1'], params['W2'], params['W_n'],
                            params['Uz'], params['Ur']], axis=1).astype(bf16)
    W_m3 = jnp.concatenate([params['Wz'], params['Wr'], params['Wh']],
                           axis=1).astype(bf16)
    W3WE = jnp.concatenate([params['W3'], params['W_e']], axis=1).astype(bf16)
    Uh = params['Uh'].astype(bf16)
    bstack = jnp.stack([params['b_m'], params['bz'], params['br'], params['bh'],
                        params['b_e'], params['ln_g'], params['ln_b']]
                       ).astype(jnp.float32)                      # [7, H]

    kern = functools.partial(
        mpnn_kernel, nb=graphs_per_block, n=N, h=H,
        mpnn_steps=MPNN_STEPS, res_conn=RES_CONN,
        use_layer_norm=USE_LAYER_NORM, use_newest_edges=USE_NEWEST_EDGES,
        update_edges_at_end_only=UPDATE_EDGES_AT_END_ONLY)

    out_nodes_f, out_edges_f = pl.pallas_call(
        kern,
        out_shape=(jax.ShapeDtypeStruct((B * N, H), jnp.float32),
                   jax.ShapeDtypeStruct((B * N * N, H), jnp.float32)),
        grid=(nblk,),
        in_specs=[
            pl.BlockSpec((BN_blk, H), lambda i: (i, 0)),       # nodes
            pl.BlockSpec((BNN_blk, H), lambda i: (i, 0)),      # edges
            pl.BlockSpec((BN_blk, 1), lambda i: (i, 0)),       # node mask (compact)
            pl.BlockSpec((BNN_blk, 1), lambda i: (i, 0)),      # edge mask (compact)
            pl.BlockSpec((H, 5 * H), lambda i: (0, 0)),        # W_h5
            pl.BlockSpec((H, 3 * H), lambda i: (0, 0)),        # W_m3
            pl.BlockSpec((H, 2 * H), lambda i: (0, 0)),        # [W3|W_e]
            pl.BlockSpec((H, H), lambda i: (0, 0)),            # Uh
            pl.BlockSpec((7, H), lambda i: (0, 0)),            # biases / LN params
        ],
        out_specs=[
            pl.BlockSpec((BN_blk, H), lambda i: (i, 0)),
            pl.BlockSpec((BNN_blk, H), lambda i: (i, 0)),
        ],
        compiler_params=pltpu.CompilerParams(
            dimension_semantics=("parallel",),
            # ~1 MiB edge blocks double-buffered + intermediates fit easily in
            # 32 MiB on every generation (raises v5e's 16 MiB default; <= v7x
            # physical 64 MiB).
            vmem_limit_bytes=32 * 1024 * 1024),
    )(nodes_f, edges_f, nmask_f, emask_f, W_h5, W_m3, W3WE, Uh, bstack)

    return (out_nodes_f.reshape(B, N, H),
            out_edges_f.reshape(B, N, N, H))


# ------------------------------ main ------------------------------------------
if __name__ == "__main__":
    B, N, H = 2, 8, DIM_H
    key = jax.random.PRNGKey(0)
    keys = jax.random.split(key, 18)

    nodes = jax.random.normal(keys[0], (B, N, H), dtype=jnp.float32)
    edges = jax.random.normal(keys[1], (B, N, N, H), dtype=jnp.float32) * 0.5

    # deterministic masks: graph 0 has 6 valid nodes, graph 1 has all 8
    nvalid = jnp.array([6, 8], dtype=jnp.int32)
    node_mask = (jnp.arange(N)[None, :] < nvalid[:, None]).astype(jnp.float32)
    edge_mask = node_mask[:, :, None] * node_mask[:, None, :]      # [B, N, N]

    nodes = nodes * node_mask[..., None]
    edges = edges * edge_mask[..., None]

    # deterministic synthetic parameters (no checkpoint load)
    wnames = ['W_n', 'W_e', 'Wz', 'Uz', 'Wr', 'Ur', 'Wh', 'Uh', 'W1', 'W2', 'W3']
    params = {nm: jax.random.normal(k, (H, H), dtype=jnp.float32) * (1.0 / H ** 0.5)
              for nm, k in zip(wnames, keys[2:13])}
    bnames = ['b_m', 'bz', 'br', 'bh', 'b_e']
    for nm, k in zip(bnames, keys[13:18]):
        params[nm] = jax.random.normal(k, (H,), dtype=jnp.float32) * 0.01
    params['ln_g'] = jnp.ones((H,), jnp.float32)
    params['ln_b'] = jnp.zeros((H,), jnp.float32)

    out_nodes, out_edges = mpnn_forward(nodes, edges, node_mask, edge_mask, params)
    jax.block_until_ready((out_nodes, out_edges))

    assert out_nodes.shape == (B, N, H)
    assert out_edges.shape == (B, N, N, H)
    assert bool(jnp.all(jnp.isfinite(out_nodes)))
    assert bool(jnp.all(jnp.isfinite(out_edges)))
    print("KERNEL_OK")
</pallas_src>

<mosaic_0001>
module attributes {stable_mosaic.version = 11 : i64} {
  func.func @mpnn_kernel(%arg0: i32, %arg1: memref<8x32xf32, #tpu.memory_space<vmem>>, %arg2: memref<64x32xf32, #tpu.memory_space<vmem>>, %arg3: memref<8x1xf32, #tpu.memory_space<vmem>>, %arg4: memref<64x1xf32, #tpu.memory_space<vmem>>, %arg5: memref<32x160xbf16, #tpu.memory_space<vmem>>, %arg6: memref<32x96xbf16, #tpu.memory_space<vmem>>, %arg7: memref<32x64xbf16, #tpu.memory_space<vmem>>, %arg8: memref<32x32xbf16, #tpu.memory_space<vmem>>, %arg9: memref<7x32xf32, #tpu.memory_space<vmem>>, %arg10: memref<8x32xf32, #tpu.memory_space<vmem>>, %arg11: memref<64x32xf32, #tpu.memory_space<vmem>>) attributes {dimension_semantics = [#tpu.dimension_semantics<parallel>], iteration_bounds = array<i64: 2>, scalar_prefetch = 0 : i64, scratch_operands = 0 : i64, tpu.core_type = #tpu.core_type<tc>, window_params = [{transform_indices = @transform_0, window_bounds = array<i64: 8, 32>}, {transform_indices = @transform_1, window_bounds = array<i64: 64, 32>}, {transform_indices = @transform_2, window_bounds = array<i64: 8, 1>}, {transform_indices = @transform_3, window_bounds = array<i64: 64, 1>}, {pipeline_mode = #tpu.pipeline_mode<synchronous>, transform_indices = @transform_4, window_bounds = array<i64: 32, 160>}, {pipeline_mode = #tpu.pipeline_mode<synchronous>, transform_indices = @transform_5, window_bounds = array<i64: 32, 96>}, {pipeline_mode = #tpu.pipeline_mode<synchronous>, transform_indices = @transform_6, window_bounds = array<i64: 32, 64>}, {pipeline_mode = #tpu.pipeline_mode<synchronous>, transform_indices = @transform_7, window_bounds = array<i64: 32, 32>}, {pipeline_mode = #tpu.pipeline_mode<synchronous>, transform_indices = @transform_8, window_bounds = array<i64: 7, 32>}, {transform_indices = @transform_9, window_bounds = array<i64: 8, 32>}, {transform_indices = @transform_10, window_bounds = array<i64: 64, 32>}]} {
    %c0 = arith.constant 0 : index
    %c0_0 = arith.constant 0 : index
    %0 = vector.load %arg1[%c0, %c0_0] : memref<8x32xf32, #tpu.memory_space<vmem>>, vector<8x32xf32>
    %c0_1 = arith.constant 0 : index
    %c0_2 = arith.constant 0 : index
    %1 = vector.load %arg2[%c0_1, %c0_2] : memref<64x32xf32, #tpu.memory_space<vmem>>, vector<64x32xf32>
    %c0_3 = arith.constant 0 : index
    %c0_4 = arith.constant 0 : index
    %2 = vector.load %arg3[%c0_3, %c0_4] : memref<8x1xf32, #tpu.memory_space<vmem>>, vector<8x1xf32>
    %c0_5 = arith.constant 0 : index
    %c0_6 = arith.constant 0 : index
    %3 = vector.load %arg4[%c0_5, %c0_6] : memref<64x1xf32, #tpu.memory_space<vmem>>, vector<64x1xf32>
    %4 = vector.shape_cast %2 : vector<8x1xf32> to vector<1x1x8x1xf32>
    %c0_7 = arith.constant 0 : index
    %c0_8 = arith.constant 0 : index
    %5 = vector.load %arg5[%c0_7, %c0_8] : memref<32x160xbf16, #tpu.memory_space<vmem>>, vector<32x160xbf16>
    %c0_9 = arith.constant 0 : index
    %c0_10 = arith.constant 0 : index
    %6 = vector.load %arg6[%c0_9, %c0_10] : memref<32x96xbf16, #tpu.memory_space<vmem>>, vector<32x96xbf16>
    %c0_11 = arith.constant 0 : index
    %c0_12 = arith.constant 0 : index
    %7 = vector.load %arg7[%c0_11, %c0_12] : memref<32x64xbf16, #tpu.memory_space<vmem>>, vector<32x64xbf16>
    %c0_13 = arith.constant 0 : index
    %c0_14 = arith.constant 0 : index
    %8 = vector.load %arg8[%c0_13, %c0_14] : memref<32x32xbf16, #tpu.memory_space<vmem>>, vector<32x32xbf16>
    %c0_15 = arith.constant 0 : index
    %c0_16 = arith.constant 0 : index
    %9 = vector.load %arg9[%c0_15, %c0_16] : memref<7x32xf32, #tpu.memory_space<vmem>>, vector<1x32xf32>
    %10 = vector.shape_cast %9 : vector<1x32xf32> to vector<32xf32>
    %c1 = arith.constant 1 : index
    %c0_17 = arith.constant 0 : index
    %11 = vector.load %arg9[%c1, %c0_17] : memref<7x32xf32, #tpu.memory_space<vmem>>, vector<1x32xf32>
    %12 = vector.shape_cast %11 : vector<1x32xf32> to vector<32xf32>
    %c2 = arith.constant 2 : index
    %c0_18 = arith.constant 0 : index
    %13 = vector.load %arg9[%c2, %c0_18] : memref<7x32xf32, #tpu.memory_space<vmem>>, vector<1x32xf32>
    %14 = vector.shape_cast %13 : vector<1x32xf32> to vector<32xf32>
    %c3 = arith.constant 3 : index
    %c0_19 = arith.constant 0 : index
    %15 = vector.load %arg9[%c3, %c0_19] : memref<7x32xf32, #tpu.memory_space<vmem>>, vector<1x32xf32>
    %16 = vector.shape_cast %15 : vector<1x32xf32> to vector<32xf32>
    %c4 = arith.constant 4 : index
    %c0_20 = arith.constant 0 : index
    %17 = vector.load %arg9[%c4, %c0_20] : memref<7x32xf32, #tpu.memory_space<vmem>>, vector<1x32xf32>
    %18 = vector.shape_cast %17 : vector<1x32xf32> to vector<32xf32>
    %c5 = arith.constant 5 : index
    %c0_21 = arith.constant 0 : index
    %19 = vector.load %arg9[%c5, %c0_21] : memref<7x32xf32, #tpu.memory_space<vmem>>, vector<1x32xf32>
    %20 = vector.shape_cast %19 : vector<1x32xf32> to vector<32xf32>
    %c6 = arith.constant 6 : index
    %c0_22 = arith.constant 0 : index
    %21 = vector.load %arg9[%c6, %c0_22] : memref<7x32xf32, #tpu.memory_space<vmem>>, vector<1x32xf32>
    %22 = vector.shape_cast %21 : vector<1x32xf32> to vector<32xf32>
    %23 = arith.truncf %1 : vector<64x32xf32> to vector<64x32xbf16>
    %cst = arith.constant dense<0.000000e+00> : vector<64x64xf32>
    %24 = tpu.matmul %23, %7, %cst {dimension_numbers = #tpu.dot_dimension_numbers<[1], [0], [0], [1], [0, 0, 1, 1], [], []>} : vector<64x32xbf16>, vector<32x64xbf16>, vector<64x64xf32> -> vector<64x64xf32>
    %25 = vector.extract_strided_slice %24 {offsets = [0, 0], sizes = [64, 32], strides = [1, 1]} : vector<64x64xf32> to vector<64x32xf32>
    %26 = arith.truncf %0 : vector<8x32xf32> to vector<8x32xbf16>
    %cst_23 = arith.constant dense<0.000000e+00> : vector<8x160xf32>
    %27 = tpu.matmul %26, %5, %cst_23 {dimension_numbers = #tpu.dot_dimension_numbers<[1], [0], [0], [1], [0, 0, 1, 1], [], []>} : vector<8x32xbf16>, vector<32x160xbf16>, vector<8x160xf32> -> vector<8x160xf32>
    %28 = vector.extract_strided_slice %27 {offsets = [0, 0], sizes = [8, 32], strides = [1, 1]} : vector<8x160xf32> to vector<8x32xf32>
    %29 = vector.shape_cast %18 : vector<32xf32> to vector<1x32xf32>
    %30 = vector.broadcast %29 : vector<1x32xf32> to vector<8x32xf32>
    %31 = arith.addf %28, %30 : vector<8x32xf32>
    %32 = vector.extract_strided_slice %27 {offsets = [0, 32], sizes = [8, 32], strides = [1, 1]} : vector<8x160xf32> to vector<8x32xf32>
    %33 = vector.extract_strided_slice %27 {offsets = [0, 64], sizes = [8, 32], strides = [1, 1]} : vector<8x160xf32> to vector<8x32xf32>
    %34 = vector.shape_cast %10 : vector<32xf32> to vector<1x32xf32>
    %35 = vector.broadcast %34 : vector<1x32xf32> to vector<8x32xf32>
    %36 = arith.addf %33, %35 : vector<8x32xf32>
    %37 = vector.extract_strided_slice %27 {offsets = [0, 96], sizes = [8, 32], strides = [1, 1]} : vector<8x160xf32> to vector<8x32xf32>
    %38 = vector.extract_strided_slice %27 {offsets = [0, 128], sizes = [8, 32], strides = [1, 1]} : vector<8x160xf32> to vector<8x32xf32>
    %39 = vector.shape_cast %25 : vector<64x32xf32> to vector<1x8x8x32xf32>
    %40 = vector.shape_cast %31 : vector<8x32xf32> to vector<1x8x1x32xf32>
    %41 = vector.broadcast %40 : vector<1x8x1x32xf32> to vector<1x8x8x32xf32>
    %42 = arith.addf %39, %41 : vector<1x8x8x32xf32>
    %43 = vector.shape_cast %32 : vector<8x32xf32> to vector<1x1x8x32xf32>
    %44 = vector.broadcast %43 : vector<1x1x8x32xf32> to vector<1x8x8x32xf32>
    %45 = arith.addf %42, %44 : vector<1x8x8x32xf32>
    %cst_24 = arith.constant 0.000000e+00 : f32
    %46 = vector.broadcast %cst_24 : f32 to vector<1x8x8x32xf32>
    %47 = arith.maximumf %45, %46 : vector<1x8x8x32xf32>
    %48 = vector.shape_cast %47 : vector<1x8x8x32xf32> to vector<64x32xf32>
    %49 = vector.broadcast %3 : vector<64x1xf32> to vector<64x32xf32>
    %50 = arith.mulf %48, %49 : vector<64x32xf32>
    %51 = arith.truncf %50 : vector<64x32xf32> to vector<64x32xbf16>
    %cst_25 = arith.constant dense<0.000000e+00> : vector<64x64xf32>
    %52 = tpu.matmul %51, %7, %cst_25 {dimension_numbers = #tpu.dot_dimension_numbers<[1], [0], [0], [1], [0, 0, 1, 1], [], []>} : vector<64x32xbf16>, vector<32x64xbf16>, vector<64x64xf32> -> vector<64x64xf32>
    %53 = vector.extract_strided_slice %52 {offsets = [0, 0], sizes = [64, 32], strides = [1, 1]} : vector<64x64xf32> to vector<64x32xf32>
    %54 = vector.extract_strided_slice %52 {offsets = [0, 32], sizes = [64, 32], strides = [1, 1]} : vector<64x64xf32> to vector<64x32xf32>
    %55 = vector.shape_cast %54 : vector<64x32xf32> to vector<1x8x8x32xf32>
    %56 = vector.shape_cast %36 : vector<8x32xf32> to vector<1x1x8x32xf32>
    %57 = vector.broadcast %56 : vector<1x1x8x32xf32> to vector<1x8x8x32xf32>
    %58 = arith.addf %55, %57 : vector<1x8x8x32xf32>
    %cst_26 = arith.constant 0.000000e+00 : f32
    %59 = vector.broadcast %cst_26 : f32 to vector<1x8x8x32xf32>
    %60 = arith.maximumf %58, %59 : vector<1x8x8x32xf32>
    %61 = vector.broadcast %4 : vector<1x1x8x1xf32> to vector<1x8x8x32xf32>
    %62 = arith.mulf %60, %61 : vector<1x8x8x32xf32>
    %cst_27 = arith.constant dense<0.000000e+00> : vector<1x8x32xf32>
    %63 = vector.multi_reduction <add>, %62, %cst_27 [2] : vector<1x8x8x32xf32> to vector<1x8x32xf32>
    %64 = vector.shape_cast %63 : vector<1x8x32xf32> to vector<8x32xf32>
    %65 = arith.truncf %64 : vector<8x32xf32> to vector<8x32xbf16>
    %cst_28 = arith.constant dense<0.000000e+00> : vector<8x96xf32>
    %66 = tpu.matmul %65, %6, %cst_28 {dimension_numbers = #tpu.dot_dimension_numbers<[1], [0], [0], [1], [0, 0, 1, 1], [], []>} : vector<8x32xbf16>, vector<32x96xbf16>, vector<8x96xf32> -> vector<8x96xf32>
    %67 = vector.extract_strided_slice %66 {offsets = [0, 0], sizes = [8, 32], strides = [1, 1]} : vector<8x96xf32> to vector<8x32xf32>
    %68 = arith.addf %67, %37 : vector<8x32xf32>
    %69 = vector.shape_cast %12 : vector<32xf32> to vector<1x32xf32>
    %70 = vector.broadcast %69 : vector<1x32xf32> to vector<8x32xf32>
    %71 = arith.addf %68, %70 : vector<8x32xf32>
    %72 = arith.negf %71 : vector<8x32xf32>
    %73 = math.exp %72 : vector<8x32xf32>
    %cst_29 = arith.constant 1.000000e+00 : f32
    %74 = vector.broadcast %cst_29 : f32 to vector<8x32xf32>
    %75 = arith.addf %74, %73 : vector<8x32xf32>
    %76 = arith.divf %74, %75 : vector<8x32xf32>
    %77 = vector.extract_strided_slice %66 {offsets = [0, 32], sizes = [8, 32], strides = [1, 1]} : vector<8x96xf32> to vector<8x32xf32>
    %78 = arith.addf %77, %38 : vector<8x32xf32>
    %79 = vector.shape_cast %14 : vector<32xf32> to vector<1x32xf32>
    %80 = vector.broadcast %79 : vector<1x32xf32> to vector<8x32xf32>
    %81 = arith.addf %78, %80 : vector<8x32xf32>
    %82 = arith.negf %81 : vector<8x32xf32>
    %83 = math.exp %82 : vector<8x32xf32>
    %cst_30 = arith.constant 1.000000e+00 : f32
    %84 = vector.broadcast %cst_30 : f32 to vector<8x32xf32>
    %85 = arith.addf %84, %83 : vector<8x32xf32>
    %86 = arith.divf %84, %85 : vector<8x32xf32>
    %87 = arith.mulf %86, %0 : vector<8x32xf32>
    %88 = arith.truncf %87 : vector<8x32xf32> to vector<8x32xbf16>
    %cst_31 = arith.constant dense<0.000000e+00> : vector<8x32xf32>
    %89 = tpu.matmul %88, %8, %cst_31 {dimension_numbers = #tpu.dot_dimension_numbers<[1], [0], [0], [1], [0, 0, 1, 1], [], []>} : vector<8x32xbf16>, vector<32x32xbf16>, vector<8x32xf32> -> vector<8x32xf32>
    %90 = vector.extract_strided_slice %66 {offsets = [0, 64], sizes = [8, 32], strides = [1, 1]} : vector<8x96xf32> to vector<8x32xf32>
    %91 = arith.addf %90, %89 : vector<8x32xf32>
    %92 = vector.shape_cast %16 : vector<32xf32> to vector<1x32xf32>
    %93 = vector.broadcast %92 : vector<1x32xf32> to vector<8x32xf32>
    %94 = arith.addf %91, %93 : vector<8x32xf32>
    %95 = math.tanh %94 : vector<8x32xf32>
    %cst_32 = arith.constant 1.000000e+00 : f32
    %96 = vector.broadcast %cst_32 : f32 to vector<8x32xf32>
    %97 = arith.subf %96, %76 : vector<8x32xf32>
    %98 = arith.mulf %97, %95 : vector<8x32xf32>
    %99 = arith.mulf %76, %0 : vector<8x32xf32>
    %100 = arith.addf %98, %99 : vector<8x32xf32>
    %cst_33 = arith.constant dense<0.000000e+00> : vector<8xf32>
    %101 = vector.multi_reduction <add>, %100, %cst_33 [1] : vector<8x32xf32> to vector<8xf32>
    %102 = vector.shape_cast %101 : vector<8xf32> to vector<8x1xf32>
    %cst_34 = arith.constant 3.200000e+01 : f32
    %103 = vector.broadcast %cst_34 : f32 to vector<8x1xf32>
    %104 = arith.divf %102, %103 : vector<8x1xf32>
    %105 = vector.broadcast %104 : vector<8x1xf32> to vector<8x32xf32>
    %106 = arith.subf %100, %105 : vector<8x32xf32>
    %107 = arith.mulf %106, %106 : vector<8x32xf32>
    %cst_35 = arith.constant dense<0.000000e+00> : vector<8xf32>
    %108 = vector.multi_reduction <add>, %107, %cst_35 [1] : vector<8x32xf32> to vector<8xf32>
    %109 = vector.shape_cast %108 : vector<8xf32> to vector<8x1xf32>
    %cst_36 = arith.constant 3.200000e+01 : f32
    %110 = vector.broadcast %cst_36 : f32 to vector<8x1xf32>
    %111 = arith.divf %109, %110 : vector<8x1xf32>
    %112 = vector.broadcast %104 : vector<8x1xf32> to vector<8x32xf32>
    %113 = arith.subf %100, %112 : vector<8x32xf32>
    %cst_37 = arith.constant 9.99999974E-6 : f32
    %114 = vector.broadcast %cst_37 : f32 to vector<8x1xf32>
    %115 = arith.addf %111, %114 : vector<8x1xf32>
    %116 = math.rsqrt %115 : vector<8x1xf32>
    %117 = vector.broadcast %116 : vector<8x1xf32> to vector<8x32xf32>
    %118 = arith.mulf %113, %117 : vector<8x32xf32>
    %119 = vector.shape_cast %20 : vector<32xf32> to vector<1x32xf32>
    %120 = vector.broadcast %119 : vector<1x32xf32> to vector<8x32xf32>
    %121 = arith.mulf %118, %120 : vector<8x32xf32>
    %122 = vector.shape_cast %22 : vector<32xf32> to vector<1x32xf32>
    %123 = vector.broadcast %122 : vector<1x32xf32> to vector<8x32xf32>
    %124 = arith.addf %121, %123 : vector<8x32xf32>
    %125 = vector.broadcast %2 : vector<8x1xf32> to vector<8x32xf32>
    %126 = arith.mulf %124, %125 : vector<8x32xf32>
    %127 = arith.addf %126, %0 : vector<8x32xf32>
    %128 = arith.addf %53, %25 : vector<64x32xf32>
    %129 = arith.truncf %127 : vector<8x32xf32> to vector<8x32xbf16>
    %cst_38 = arith.constant dense<0.000000e+00> : vector<8x160xf32>
    %130 = tpu.matmul %129, %5, %cst_38 {dimension_numbers = #tpu.dot_dimension_numbers<[1], [0], [0], [1], [0, 0, 1, 1], [], []>} : vector<8x32xbf16>, vector<32x160xbf16>, vector<8x160xf32> -> vector<8x160xf32>
    %131 = vector.extract_strided_slice %130 {offsets = [0, 0], sizes = [8, 32], strides = [1, 1]} : vector<8x160xf32> to vector<8x32xf32>
    %132 = vector.shape_cast %18 : vector<32xf32> to vector<1x32xf32>
    %133 = vector.broadcast %132 : vector<1x32xf32> to vector<8x32xf32>
    %134 = arith.addf %131, %133 : vector<8x32xf32>
    %135 = vector.extract_strided_slice %130 {offsets = [0, 32], sizes = [8, 32], strides = [1, 1]} : vector<8x160xf32> to vector<8x32xf32>
    %136 = vector.extract_strided_slice %130 {offsets = [0, 64], sizes = [8, 32], strides = [1, 1]} : vector<8x160xf32> to vector<8x32xf32>
    %137 = vector.shape_cast %10 : vector<32xf32> to vector<1x32xf32>
    %138 = vector.broadcast %137 : vector<1x32xf32> to vector<8x32xf32>
    %139 = arith.addf %136, %138 : vector<8x32xf32>
    %140 = vector.extract_strided_slice %130 {offsets = [0, 96], sizes = [8, 32], strides = [1, 1]} : vector<8x160xf32> to vector<8x32xf32>
    %141 = vector.extract_strided_slice %130 {offsets = [0, 128], sizes = [8, 32], strides = [1, 1]} : vector<8x160xf32> to vector<8x32xf32>
    %142 = vector.shape_cast %128 : vector<64x32xf32> to vector<1x8x8x32xf32>
    %143 = vector.shape_cast %134 : vector<8x32xf32> to vector<1x8x1x32xf32>
    %144 = vector.broadcast %143 : vector<1x8x1x32xf32> to vector<1x8x8x32xf32>
    %145 = arith.addf %142, %144 : vector<1x8x8x32xf32>
    %146 = vector.shape_cast %135 : vector<8x32xf32> to vector<1x1x8x32xf32>
    %147 = vector.broadcast %146 : vector<1x1x8x32xf32> to vector<1x8x8x32xf32>
    %148 = arith.addf %145, %147 : vector<1x8x8x32xf32>
    %cst_39 = arith.constant 0.000000e+00 : f32
    %149 = vector.broadcast %cst_39 : f32 to vector<1x8x8x32xf32>
    %150 = arith.maximumf %148, %149 : vector<1x8x8x32xf32>
    %151 = vector.shape_cast %150 : vector<1x8x8x32xf32> to vector<64x32xf32>
    %152 = vector.broadcast %3 : vector<64x1xf32> to vector<64x32xf32>
    %153 = arith.mulf %151, %152 : vector<64x32xf32>
    %154 = arith.truncf %153 : vector<64x32xf32> to vector<64x32xbf16>
    %cst_40 = arith.constant dense<0.000000e+00> : vector<64x64xf32>
    %155 = tpu.matmul %154, %7, %cst_40 {dimension_numbers = #tpu.dot_dimension_numbers<[1], [0], [0], [1], [0, 0, 1, 1], [], []>} : vector<64x32xbf16>, vector<32x64xbf16>, vector<64x64xf32> -> vector<64x64xf32>
    %156 = vector.extract_strided_slice %155 {offsets = [0, 32], sizes = [64, 32], strides = [1, 1]} : vector<64x64xf32> to vector<64x32xf32>
    %157 = vector.shape_cast %156 : vector<64x32xf32> to vector<1x8x8x32xf32>
    %158 = vector.shape_cast %139 : vector<8x32xf32> to vector<1x1x8x32xf32>
    %159 = vector.broadcast %158 : vector<1x1x8x32xf32> to vector<1x8x8x32xf32>
    %160 = arith.addf %157, %159 : vector<1x8x8x32xf32>
    %cst_41 = arith.constant 0.000000e+00 : f32
    %161 = vector.broadcast %cst_41 : f32 to vector<1x8x8x32xf32>
    %162 = arith.maximumf %160, %161 : vector<1x8x8x32xf32>
    %163 = vector.broadcast %4 : vector<1x1x8x1xf32> to vector<1x8x8x32xf32>
    %164 = arith.mulf %162, %163 : vector<1x8x8x32xf32>
    %cst_42 = arith.constant dense<0.000000e+00> : vector<1x8x32xf32>
    %165 = vector.multi_reduction <add>, %164, %cst_42 [2] : vector<1x8x8x32xf32> to vector<1x8x32xf32>
    %166 = vector.shape_cast %165 : vector<1x8x32xf32> to vector<8x32xf32>
    %167 = arith.truncf %166 : vector<8x32xf32> to vector<8x32xbf16>
    %cst_43 = arith.constant dense<0.000000e+00> : vector<8x96xf32>
    %168 = tpu.matmul %167, %6, %cst_43 {dimension_numbers = #tpu.dot_dimension_numbers<[1], [0], [0], [1], [0, 0, 1, 1], [], []>} : vector<8x32xbf16>, vector<32x96xbf16>, vector<8x96xf32> -> vector<8x96xf32>
    %169 = vector.extract_strided_slice %168 {offsets = [0, 0], sizes = [8, 32], strides = [1, 1]} : vector<8x96xf32> to vector<8x32xf32>
    %170 = arith.addf %169, %140 : vector<8x32xf32>
    %171 = vector.shape_cast %12 : vector<32xf32> to vector<1x32xf32>
    %172 = vector.broadcast %171 : vector<1x32xf32> to vector<8x32xf32>
    %173 = arith.addf %170, %172 : vector<8x32xf32>
    %174 = arith.negf %173 : vector<8x32xf32>
    %175 = math.exp %174 : vector<8x32xf32>
    %cst_44 = arith.constant 1.000000e+00 : f32
    %176 = vector.broadcast %cst_44 : f32 to vector<8x32xf32>
    %177 = arith.addf %176, %175 : vector<8x32xf32>
    %178 = arith.divf %176, %177 : vector<8x32xf32>
    %179 = vector.extract_strided_slice %168 {offsets = [0, 32], sizes = [8, 32], strides = [1, 1]} : vector<8x96xf32> to vector<8x32xf32>
    %180 = arith.addf %179, %141 : vector<8x32xf32>
    %181 = vector.shape_cast %14 : vector<32xf32> to vector<1x32xf32>
    %182 = vector.broadcast %181 : vector<1x32xf32> to vector<8x32xf32>
    %183 = arith.addf %180, %182 : vector<8x32xf32>
    %184 = arith.negf %183 : vector<8x32xf32>
    %185 = math.exp %184 : vector<8x32xf32>
    %cst_45 = arith.constant 1.000000e+00 : f32
    %186 = vector.broadcast %cst_45 : f32 to vector<8x32xf32>
    %187 = arith.addf %186, %185 : vector<8x32xf32>
    %188 = arith.divf %186, %187 : vector<8x32xf32>
    %189 = arith.mulf %188, %127 : vector<8x32xf32>
    %190 = arith.truncf %189 : vector<8x32xf32> to vector<8x32xbf16>
    %cst_46 = arith.constant dense<0.000000e+00> : vector<8x32xf32>
    %191 = tpu.matmul %190, %8, %cst_46 {dimension_numbers = #tpu.dot_dimension_numbers<[1], [0], [0], [1], [0, 0, 1, 1], [], []>} : vector<8x32xbf16>, vector<32x32xbf16>, vector<8x32xf32> -> vector<8x32xf32>
    %192 = vector.extract_strided_slice %168 {offsets = [0, 64], sizes = [8, 32], strides = [1, 1]} : vector<8x96xf32> to vector<8x32xf32>
    %193 = arith.addf %192, %191 : vector<8x32xf32>
    %194 = vector.shape_cast %16 : vector<32xf32> to vector<1x32xf32>
    %195 = vector.broadcast %194 : vector<1x32xf32> to vector<8x32xf32>
    %196 = arith.addf %193, %195 : vector<8x32xf32>
    %197 = math.tanh %196 : vector<8x32xf32>
    %cst_47 = arith.constant 1.000000e+00 : f32
    %198 = vector.broadcast %cst_47 : f32 to vector<8x32xf32>
    %199 = arith.subf %198, %178 : vector<8x32xf32>
    %200 = arith.mulf %199, %197 : vector<8x32xf32>
    %201 = arith.mulf %178, %127 : vector<8x32xf32>
    %202 = arith.addf %200, %201 : vector<8x32xf32>
    %cst_48 = arith.constant dense<0.000000e+00> : vector<8xf32>
    %203 = vector.multi_reduction <add>, %202, %cst_48 [1] : vector<8x32xf32> to vector<8xf32>
    %204 = vector.shape_cast %203 : vector<8xf32> to vector<8x1xf32>
    %cst_49 = arith.constant 3.200000e+01 : f32
    %205 = vector.broadcast %cst_49 : f32 to vector<8x1xf32>
    %206 = arith.divf %204, %205 : vector<8x1xf32>
    %207 = vector.broadcast %206 : vector<8x1xf32> to vector<8x32xf32>
    %208 = arith.subf %202, %207 : vector<8x32xf32>
    %209 = arith.mulf %208, %208 : vector<8x32xf32>
    %cst_50 = arith.constant dense<0.000000e+00> : vector<8xf32>
    %210 = vector.multi_reduction <add>, %209, %cst_50 [1] : vector<8x32xf32> to vector<8xf32>
    %211 = vector.shape_cast %210 : vector<8xf32> to vector<8x1xf32>
    %cst_51 = arith.constant 3.200000e+01 : f32
    %212 = vector.broadcast %cst_51 : f32 to vector<8x1xf32>
    %213 = arith.divf %211, %212 : vector<8x1xf32>
    %214 = vector.broadcast %206 : vector<8x1xf32> to vector<8x32xf32>
    %215 = arith.subf %202, %214 : vector<8x32xf32>
    %cst_52 = arith.constant 9.99999974E-6 : f32
    %216 = vector.broadcast %cst_52 : f32 to vector<8x1xf32>
    %217 = arith.addf %213, %216 : vector<8x1xf32>
    %218 = math.rsqrt %217 : vector<8x1xf32>
    %219 = vector.broadcast %218 : vector<8x1xf32> to vector<8x32xf32>
    %220 = arith.mulf %215, %219 : vector<8x32xf32>
    %221 = vector.shape_cast %20 : vector<32xf32> to vector<1x32xf32>
    %222 = vector.broadcast %221 : vector<1x32xf32> to vector<8x32xf32>
    %223 = arith.mulf %220, %222 : vector<8x32xf32>
    %224 = vector.shape_cast %22 : vector<32xf32> to vector<1x32xf32>
    %225 = vector.broadcast %224 : vector<1x32xf32> to vector<8x32xf32>
    %226 = arith.addf %223, %225 : vector<8x32xf32>
    %227 = vector.broadcast %2 : vector<8x1xf32> to vector<8x32xf32>
    %228 = arith.mulf %226, %227 : vector<8x32xf32>
    %229 = arith.addf %228, %0 : vector<8x32xf32>
    %230 = arith.addf %153, %1 : vector<64x32xf32>
    %c0_53 = arith.constant 0 : index
    %c0_54 = arith.constant 0 : index
    %231 = vector.load %arg10[%c0_53, %c0_54] : memref<8x32xf32, #tpu.memory_space<vmem>>, vector<8x32xf32>
    tpu.vector_store %arg10[%c0_53, %c0_54], %229 {strides = array<i32>} : memref<8x32xf32, #tpu.memory_space<vmem>>, vector<8x32xf32>,
    %c0_55 = arith.constant 0 : index
    %c0_56 = arith.constant 0 : index
    %232 = vector.load %arg11[%c0_55, %c0_56] : memref<64x32xf32, #tpu.memory_space<vmem>>, vector<64x32xf32>
    tpu.vector_store %arg11[%c0_55, %c0_56], %230 {strides = array<i32>} : memref<64x32xf32, #tpu.memory_space<vmem>>, vector<64x32xf32>,
    return
  }
  func.func @transform_0(%arg0: i32) -> (i32, i32) {
    %c0_i32 = arith.constant 0 : i32
    %c0_i32_0 = arith.constant 0 : i32
    return %arg0, %c0_i32 : i32, i32
  }
  func.func @transform_1(%arg0: i32) -> (i32, i32) {
    %c0_i32 = arith.constant 0 : i32
    %c0_i32_0 = arith.constant 0 : i32
    return %arg0, %c0_i32 : i32, i32
  }
  func.func @transform_2(%arg0: i32) -> (i32, i32) {
    %c0_i32 = arith.constant 0 : i32
    %c0_i32_0 = arith.constant 0 : i32
    return %arg0, %c0_i32 : i32, i32
  }
  func.func @transform_3(%arg0: i32) -> (i32, i32) {
    %c0_i32 = arith.constant 0 : i32
    %c0_i32_0 = arith.constant 0 : i32
    return %arg0, %c0_i32 : i32, i32
  }
  func.func @transform_4(%arg0: i32) -> (i32, i32) {
    %c0_i32 = arith.constant 0 : i32
    %c0_i32_0 = arith.constant 0 : i32
    %c0_i32_1 = arith.constant 0 : i32
    return %c0_i32, %c0_i32_0 : i32, i32
  }
  func.func @transform_5(%arg0: i32) -> (i32, i32) {
    %c0_i32 = arith.constant 0 : i32
    %c0_i32_0 = arith.constant 0 : i32
    %c0_i32_1 = arith.constant 0 : i32
    return %c0_i32, %c0_i32_0 : i32, i32
  }
  func.func @transform_6(%arg0: i32) -> (i32, i32) {
    %c0_i32 = arith.constant 0 : i32
    %c0_i32_0 = arith.constant 0 : i32
    %c0_i32_1 = arith.constant 0 : i32
    return %c0_i32, %c0_i32_0 : i32, i32
  }
  func.func @transform_7(%arg0: i32) -> (i32, i32) {
    %c0_i32 = arith.constant 0 : i32
    %c0_i32_0 = arith.constant 0 : i32
    %c0_i32_1 = arith.constant 0 : i32
    return %c0_i32, %c0_i32_0 : i32, i32
  }
  func.func @transform_8(%arg0: i32) -> (i32, i32) {
    %c0_i32 = arith.constant 0 : i32
    %c0_i32_0 = arith.constant 0 : i32
    %c0_i32_1 = arith.constant 0 : i32
    return %c0_i32, %c0_i32_0 : i32, i32
  }
  func.func @transform_9(%arg0: i32) -> (i32, i32) {
    %c0_i32 = arith.constant 0 : i32
    %c0_i32_0 = arith.constant 0 : i32
    return %arg0, %c0_i32 : i32, i32
  }
  func.func @transform_10(%arg0: i32) -> (i32, i32) {
    %c0_i32 = arith.constant 0 : i32
    %c0_i32_0 = arith.constant 0 : i32
    return %arg0, %c0_i32 : i32, i32
  }
}

</mosaic_0001>

<bundles_post_ra>
// kernel: tpu_custom_call.1
= control target key start
LH: loop header
LB: loop body
LE: loop exit
PB: predicated region body
PF: predicated region fallthrough
CT: control target
= control target key end

     0   :  { %s2416_s0 = inlined_call_operand.vmem [shape: f32[16,32], index: 0, kind: input, shape index: {}]   ;;  %s2417_s1 = inlined_call_operand.vmem [shape: f32[128,32], index: 1, kind: input, shape index: {}]   ;;  %s2418_s2 = inlined_call_operand.vmem [shape: f32[16,1], index: 2, kind: input, shape index: {}]   ;;  %s2419_s3 = inlined_call_operand.vmem [shape: f32[128,1], index: 3, kind: input, shape index: {}]   ;;  %s2420_s4 = inlined_call_operand.vmem [shape: bf16[32,160], index: 4, kind: input, shape index: {}]   ;;  %s2421_s5 = inlined_call_operand.vmem [shape: bf16[32,96], index: 5, kind: input, shape index: {}]   ;;  %s2422_s6 = inlined_call_operand.vmem [shape: bf16[32,64], index: 6, kind: input, shape index: {}]   ;;  %s2423_s7 = inlined_call_operand.vmem [shape: bf16[32,32], index: 7, kind: input, shape index: {}]   ;;  %s2424_s8 = inlined_call_operand.vmem [shape: f32[7,32], index: 8, kind: input, shape index: {}]   ;;  %s2425_s9 = inlined_call_operand.hbm [shape: f32[16,32], index: 9, kind: output, shape index: {0}]   ;;  %s2426_s10 = inlined_call_operand.vmem [shape: f32[128,32], index: 10, kind: output, shape index: {1}]  }
   0x1   :  { %2441 = sst [smem:[#allocation15_spill]] %s2416_s0 }
   0x2   :  { %16 = vsyncpa [#allocation3], 0 }
   0x3   :  { %18 = vsyncpa [#allocation3 + $0x1], 0  ;;  %s1891_s13 = smov 0   ;;  %s1893_s14 = smov 0  }
   0x4   :  { %s1895_s15 = smov 0   ;;  %s1897_s16 = smov 0  }
   0x5 LB: > { %s1912_s17 = sadd.s32 4294967295, %s1829_s16   ;;  %s1595_s18 = sadd.s32 4294967294, %s1829_s16   ;;  %s1829_s16 = sphi %s1897_s16, %s2470_s16   ;;  %s1825_s15 = sphi %s1895_s15, %s2469_s15   ;;  %s1821_s14 = sphi %s1893_s14, %s2468_s14   ;;  %s1817_s13 = sphi %s1891_s13, %s2467_s13  }
   0x6   : > { %s1916_s19 = sadd.s32 1, %s1829_s16   ;;  %s240_s20 = sadd.s32 1, %s1825_s15 }
   0x7   : > { %s237_s21 = ssub.s32 %s1829_s16, %s1916_s19  ;;  %p250_p0 = scmp.ne.s32.totalorder %s1825_s15, %s1821_s14 }
   0x8   : > { %p238_p1 = scmp.eq.s32.totalorder %s237_s21, 0  ;;  %p251_p2 = scmp.eq.s32.totalorder %s1912_s17, 1 }
   0x9   : > { %p256_p3 = scmp.ne.s32.totalorder %s1821_s14, %s1817_s13  ;;  %p257_p4 = scmp.eq.s32.totalorder %s1595_s18, 1 }
   0xa   : > { %s1927_s22 = scalar_select %p238_p1, %s1825_s15, %s240_s20  }
   0xb   : > { %p1929_p5 = por %p251_p2, %p250_p0  ;;  %p1933_p6 = por %p257_p4, %p256_p3 }
   0xc   : > { %p1598_p7 = scmp.ge.s32.totalorder %s1829_s16, 1  ;;  %p348_p8 = scmp.lt.s32.totalorder %s1829_s16, 3 }
   0xe   : > { %p349_p9 = pnand %p1598_p7, %p348_p8 }
  0x10   : > { %352 = sbr.rel (%p349_p9) target bundleno = 3009 (0xbc1), region = 56 }
  0x15   : > { %v1683_v0 = vld [vmem:[%s2422_s6 + $0x8] sm:$0xff]  ;;  %v1630_v1 = vld [vmem:[%s2420_s4 + $0x10] sm:$0xf]  ;;  %v1679_v2 = vld [vmem:[%s2420_s4 + $0x14] sm:$0xf0]  ;;  %v1831_v4 = vmov 0  }
  0x16   : > { %v1631_v3 = vor.u32 %v1679_v2, %v1630_v1  ;;  %1731 = vset.pattern.permute.xlu1 %v1831_v4  ;;  %v1622_v5 = vld [vmem:[%s2420_s4] sm:$0xf]  ;;  %v1677_v6 = vld [vmem:[%s2420_s4 + $0x4] sm:$0xf0]  ;;  %s1955_s21 = sshll.u32 %s1912_s17, 3  ;;  %1732 = vset.pattern.permute.xlu2 %v1831_v4  ;;  %p404_p11 = scmp.lt.s32.totalorder %s1912_s17, 1 }
  0x17   : > { %507 = vmatpush.bf16.msra.mxu0 %v1683_v0  ;;  %v1682_v7 = vld [vmem:[%s2422_s6] sm:$0xff]  ;;  %p409_p10 = scmp.lt.s32.totalorder %s1955_s21, 15  ;;  %1730 = vset.pattern.permute.xlu0 %v1831_v4  ;;  %v1623_v8 = vor.u32 %v1677_v6, %v1622_v5  ;;  %vm488_vm0 = vcmask 261120   ;;  %s2446_s0 = sld [smem:[#allocation15_spill]]  ;;  %vm766_vm1 = vcmask 523520   ;;  %vm847_vm2 = vcmask 1041409  }
  0x18   : > { %560 = vmatpush.bf16.msra.mxu2 %v1631_v3  ;;  %710 = vmatpush.bf16.msra.mxu3 %v1683_v0  ;;  %s2472_s17 = smov (!%p404_p11, %s1912_s17), 1  ;;  %v1733_v20 = vld [vmem:[%s2424_s8] ss:$0 sm:$0xff]  ;;  %s2427_s18 = smov 64   ;;  %v2070_v41 = vld [vmem:[%s2424_s8 + $0x4] ss:$0 sm:$0xff] }
  0x19   : > { %s410_s27 = scalar_select %p409_p10, %s1955_s21, 15  ;;  %1057 = vmatpush.bf16.msra.mxu1 %v1631_v3  ;;  %vm849_vm3 = vcmask 1042434   ;;  %vm851_vm4 = vcmask 1043459   ;;  %vm853_vm5 = vcmask 1044484   ;;  %vm855_vm6 = vcmask 1045509  }
  0x1a   : > { %s1600_s25 = sshll.u32 %s2472_s17, 3  ;;  %vm857_vm7 = vcmask 1046534   ;;  %vm859_vm8 = vcmask 1047559  }
  0x1b   : > { %508 = vmatpush.bf16.msra.mxu0 %v1682_v7  ;;  %s1966_s28 = sshll.u32 %s410_s27, 3  ;;  %s417_s30 = scalar_lea.vmem %s2418_s2, %s1600_s25 }
  0x1c   : > { %561 = vmatpush.bf16.msra.mxu2 %v1623_v8  ;;  %s1972_s11 = scalar_lea.vmem %s2419_s3, %s1966_s28  ;;  %711 = vmatpush.bf16.msra.mxu3 %v1682_v7  ;;  %s1979_s20 = scalar_lea.vmem %s2417_s1, %s1966_s28  ;;  %v440_v39 = vld [vmem:[%s417_s30] sm:$0xff] }
  0x1d   : > { %v442_v9 = vld [vmem:[%s1972_s11 + $0x8] sm:$0xff]  ;;  %1058 = vmatpush.bf16.msra.mxu1 %v1623_v8  ;;  %v1983_v10 = vld [vmem:[%s1979_s20] sm:$0xff]  ;;  %s1993_s29 = scalar_lea.vmem %s2446_s0, %s1600_s25  ;;  %v443_v15 = vld [vmem:[%s1972_s11 + $0x10] sm:$0xff]  ;;  %s2456_s27 = smov 64  }
  0x1e   : > { %647 = vperm.xlu1 %1731, %v442_v9   ;;  %2444 = vst [vmem:[#allocation5_spill] sm:$0xff] %v1983_v10  ;;  %v1986_v11 = vld [vmem:[%s1979_s20 + $0x8] sm:$0xff]  ;;  %v1998_v13 = vld [vmem:[%s1993_s29] sm:$0xff]  ;;  %v2009_v16 = vld [vmem:[%s1979_s20 + $0x10] sm:$0xff]  ;;  %s428_s17 = scalar_lea.vmem %s2426_s10, %s1966_s28  ;;  %s394_s28 = sand.u32 1, %s1821_s14  }
  0x1f   : > { %2445 = vst [vmem:[#allocation6_spill] sm:$0xff] %v1986_v11  ;;  %v472_v12 = vpack.c.bf16 %v1986_v11, %v1983_v10  ;;  %v2002_v14 = vpack.c.bf16 %v1998_v13, %v1998_v13  ;;  %v2012_v17 = vld [vmem:[%s1979_s20 + $0x18] sm:$0xff]  ;;  %v446_v18 = vld [vmem:[%s1972_s11 + $0x28] sm:$0xff]  ;;  %v2023_v21 = vld [vmem:[%s1979_s20 + $0x20] sm:$0xff]  ;;  %s1451_s12 = scalar_lea.sflag [#allocation3], %s394_s28 }
  0x20   : > { %2447 = vst [vmem:[#allocation7_spill] sm:$0xff] %v2009_v16  ;;  %v473_v19 = vpack.c.bf16 %v2012_v17, %v2009_v16  ;;  %v2026_v22 = vld [vmem:[%s1979_s20 + $0x28] sm:$0xff]  ;;  %v2032_v24 = vld [vmem:[%s1979_s20 + $0x30] sm:$0xff]  ;;  %v2035_v25 = vld [vmem:[%s1979_s20 + $0x38] sm:$0xff]  ;;  %s2429_s20 = smov 96  }
  0x21   : > { %1161 = vmatpush.bf16.msrb.mxu1 %v1683_v0  ;;  %1616 = vmatmul.msk.bf16.vlgmr.msra.gmra.mxu0 %vm488_vm0, %v472_v12  ;;  %2448 = vst [vmem:[#allocation8_spill] sm:$0xff] %v2012_v17  ;;  %v474_v23 = vpack.c.bf16 %v2026_v22, %v2023_v21  ;;  %v475_v26 = vpack.c.bf16 %v2035_v25, %v2032_v24  ;;  %v444_v27 = vld [vmem:[%s1972_s11 + $0x18] sm:$0xff]  ;;  %v445_v28 = vld [vmem:[%s1972_s11 + $0x20] sm:$0xff]  ;;  %v447_v29 = vld [vmem:[%s1972_s11 + $0x30] sm:$0xff] }
  0x22   : > { %1636 = vmatmul.msk.bf16.vlgmr.msra.gmra.mxu2 %vm488_vm0, %v2002_v14  ;;  %2449 = vst [vmem:[#allocation9_spill] sm:$0xff] %v2023_v21  ;;  %657 = vperm.xlu2 %1732, %v444_v27   ;;  %v441_v36 = vld [vmem:[%s1972_s11] sm:$0xff]  ;;  %v448_v38 = vld [vmem:[%s1972_s11 + $0x38] sm:$0xff]  ;;  %s1466_s11 = scalar_lea.hbm %s2425_s9, %s1955_s21 }
  0x23   : > { %2450 = vst [vmem:[#allocation10_spill] sm:$0xff] %v2026_v22  ;;  %s1470_s30 = sshll.u32 %s1466_s11, 4  ;;  %s1471_s30 = int_to_ptr.hbm [resolvable:$true] %s1470_s30 }
  0x24   : > { %2451 = vst [vmem:[#allocation11_spill] sm:$0xff] %v2032_v24 }
  0x25   : > { %1162 = vmatpush.bf16.msrb.mxu1 %v1682_v7  ;;  %2452 = vst [vmem:[#allocation12_spill] sm:$0xff] %v2035_v25 }
  0x26   : > { %652 = vperm.xlu1 %1731, %v443_v15  }
  0x2a   : > { %662 = vperm.xlu2 %1732, %v445_v28  }
  0x2e   : > { %667 = vperm.xlu1 %1731, %v446_v18  }
  0x31   : > { %1617 = vmatmul.msk.bf16.gmra.mxu0 %vm488_vm0, %v473_v19 }
  0x32   : > { %672 = vperm.xlu2 %1732, %v447_v29  }
  0x36   : > { %584 = vrot.lane.b32.xlu1 %v1733_v20, %s2427_s18  ;;  %s1834_s18 = smov 32  }
  0x41   : > { %1618 = vmatmul.msk.bf16.gmra.mxu0 %vm488_vm0, %v474_v23 }
  0x51   : > { %1619 = vmatmul.msk.bf16.gmra.mxu0 %vm488_vm0, %v475_v26 }
  0x7c   : > { %v2091_v7 = vpop.permute.xlu2 %657 }
  0x90   : > { %v2043_v30 = vpop.permute.xlu1 %647 }
  0x98   : > { %v2045_v31 = vpop.permute.xlu1 %652 }
  0x9e   : > { %v2065_v40 = vpop.f32.mrf.mxu0 }
  0xa0   : > { %v2047_v32 = vpop.permute.xlu1 %667 }
  0xa5   : > { %v2049_v33 = vpop.f32.mrf.mxu2 }
  0xa6   : > { %621 = vrot.lane.b32.xlu0 %v2049_v33, %s2429_s20  ;;  %v2072_v42 = vpop.f32.mrf.mxu0  ;;  %v581_v43 = vadd.f32 %v2070_v41, %v2049_v33 }
  0xa8   : > { %v2053_v34 = vpop.permute.xlu1 %584  ;;  %v589_v44 = vrot.slane %v581_v43, 1  ;;  %v596_v47 = vperm.slane %v581_v43, 0  ;;  %v590_v55 = vrot.slane %v581_v43, 2  ;;  %v591_v56 = vrot.slane %v581_v43, 3 }
  0xa9   : > { %v587_v35 = vadd.f32 %v2053_v34, %v2049_v33  ;;  %v592_v8 = vrot.slane %v581_v43, 4  ;;  %v593_v9 = vrot.slane %v581_v43, 5 }
  0xaa   : > { %v597_v46 = vperm.slane %v589_v44, 0  ;;  %v612_v50 = vadd.f32 %v596_v47, %v2065_v40  ;;  %v598_v61 = vperm.slane %v590_v55, 0  ;;  %v599_v62 = vperm.slane %v591_v56, 0 }
  0xab   : > { %734 = vrot.lane.b32.xlu2 %v587_v35, %s2429_s20  ;;  %v600_v19 = vperm.slane %v592_v8, 0  ;;  %v601_v20 = vperm.slane %v593_v9, 0  ;;  %v595_v47 = vrot.slane %v581_v43, 7  ;;  %s2455_s20 = smov 96  }
  0xac   : > { %v613_v48 = vadd.f32 %v597_v46, %v2072_v42  ;;  %v594_v46 = vrot.slane %v581_v43, 6 }
  0xad   : > { %v565_v37 = vpop.f32.mrf.mxu2 }
  0xae   : > { %642 = vperm.xlu0 %1730, %v441_v36   ;;  %v2076_v45 = vpop.f32.mrf.mxu0 }
  0xaf   : > { %v614_v0 = vadd.f32 %v598_v61, %v2076_v45 }
  0xb6   : > { %677 = vperm.xlu0 %1730, %v448_v38   ;;  %v2080_v53 = vpop.f32.mrf.mxu0  ;;  %v2102_v38 = vpop.permute.xlu2 %662 }
  0xb7   : > { %v615_v1 = vadd.f32 %v599_v62, %v2080_v53 }
  0xbe   : > { %755 = vperm.xlu0 %1730, %v440_v39   ;;  %v2089_v2 = vpop.f32.mrf.mxu0  ;;  %v2114_v43 = vpop.permute.xlu2 %672 }
  0xbf   : > { %v616_v26 = vadd.f32 %v600_v19, %v2089_v2  ;;  %2454 = vst [vmem:[#allocation14_spill] sm:$0xff] %v2114_v43 }
  0xc6   : > { %v2095_v18 = vpop.f32.mrf.mxu0 }
  0xc7   : > { %v617_v27 = vadd.f32 %v601_v20, %v2095_v18 }
  0xce   : > { %v2100_v35 = vpop.f32.mrf.mxu0 }
 0x118   : > { %v622_v49 = vpop.permute.xlu0 %621 }
 0x119   : > { %v625_v51 = vadd.f32 %v622_v49, %v613_v48  ;;  %v624_v52 = vadd.f32 %v622_v49, %v612_v50  ;;  %v626_v3 = vadd.f32 %v622_v49, %v614_v0  ;;  %v627_v4 = vadd.f32 %v622_v49, %v615_v1  ;;  %v2106_v50 = vpop.f32.mrf.mxu0 }
 0x11a   : > { %v628_v28 = vadd.f32 %v622_v49, %v616_v26  ;;  %v629_v29 = vadd.f32 %v622_v49, %v617_v27 }
 0x11b   : > { %v633_v54 = vmax.f32 %v625_v51, 0.0  ;;  %v632_v57 = vmax.f32 %v624_v52, 0.0  ;;  %v634_v5 = vmax.f32 %v626_v3, 0.0  ;;  %v635_v6 = vmax.f32 %v627_v4, 0.0 }
 0x11c   : > { %v636_v36 = vmax.f32 %v628_v28, 0.0  ;;  %v637_v37 = vmax.f32 %v629_v29, 0.0  ;;  %v602_v51 = vperm.slane %v594_v46, 0  ;;  %v603_v52 = vperm.slane %v595_v47, 0 }
 0x11d   : > { %v681_v60 = vmul.f32 %v2043_v30, %v633_v54  ;;  %v682_v12 = vmul.f32 %v2045_v31, %v634_v5  ;;  %v683_v15 = vmul.f32 %v2091_v7, %v635_v6  ;;  %v2126_v5 = vpop.permute.xlu2 %734 }
 0x11e   : > { %v684_v39 = vmul.f32 %v2102_v38, %v636_v36  ;;  %v685_v44 = vmul.f32 %v2047_v32, %v637_v37  ;;  %v618_v54 = vadd.f32 %v602_v51, %v2100_v35  ;;  %v619_v55 = vadd.f32 %v603_v52, %v2106_v50 }
 0x11f   : > { %v689_v23 = vpack.c.bf16 %v683_v15, %v682_v12 }
 0x120   : > { %v2082_v58 = vpop.permute.xlu0 %642  ;;  %v690_v48 = vpack.c.bf16 %v685_v44, %v684_v39  ;;  %v630_v56 = vadd.f32 %v622_v49, %v618_v54 }
 0x121   : > { %v680_v59 = vmul.f32 %v2082_v58, %v632_v57  ;;  %v631_v57 = vadd.f32 %v622_v49, %v619_v55 }
 0x123   : > { %v688_v63 = vpack.c.bf16 %v681_v60, %v680_v59  ;;  %v638_v60 = vmax.f32 %v630_v56, 0.0  ;;  %v639_v61 = vmax.f32 %v631_v57, 0.0 }
 0x125   : > { %1638 = vmatmul.msk.bf16.vlgmr.msra.gmra.mxu3 %vm488_vm0, %v688_v63  ;;  %v686_v63 = vmul.f32 %v2114_v43, %v638_v60 }
 0x128   : > { %v2111_v59 = vpop.permute.xlu0 %677 }
 0x129   : > { %2453 = vst [vmem:[#allocation13_spill] sm:$0xff] %v2111_v59  ;;  %v687_v62 = vmul.f32 %v2111_v59, %v639_v61 }
 0x12b   : > { %v691_v0 = vpack.c.bf16 %v687_v62, %v686_v63 }
 0x130   : > { %v2140_v28 = vpop.permute.xlu0 %755 }
 0x135   : > { %1639 = vmatmul.msk.bf16.gmra.mxu3 %vm488_vm0, %v689_v23 }
 0x145   : > { %1640 = vmatmul.msk.bf16.gmra.mxu3 %vm488_vm0, %v690_v48 }
 0x155   : > { %1641 = vmatmul.msk.bf16.gmra.mxu3 %vm488_vm0, %v691_v0 }
 0x1a8   : > { %v2118_v1 = vpop.f32.mrf.mxu3 }
 0x1a9   : > { %v737_v9 = vadd.f32 %v2126_v5, %v2118_v1 }
 0x1ab   : > { %v745_v23 = vmax.f32 %v737_v9, 0.0 }
 0x1ad   : > { %v758_v39 = vmul.f32 %v2140_v28, %v745_v23 }
 0x1af   : > { %v767_v52 = vsel %vm766_vm1, %v758_v39, 0.0 }
 0x1b0   : > { %v2120_v3 = vpop.f32.mrf.mxu3  ;;  %v768_v62 = vrot.slane %v767_v52, 4 }
 0x1b1   : > { %v738_v6 = vadd.f32 %v2126_v5, %v2120_v3 }
 0x1b3   : > { %v746_v15 = vmax.f32 %v738_v6, 0.0 }
 0x1b5   : > { %v759_v29 = vmul.f32 %v2140_v28, %v746_v15  ;;  %v769_v15 = vadd.f32 %v768_v62, %v767_v52  ;;  %v2186_v62 = vld [vmem:[%s2421_s5] sm:$0xff] }
 0x1b7   : > { %v774_v47 = vsel %vm766_vm1, %v759_v29, 0.0  ;;  %v770_v52 = vrot.slane %v769_v15, 2 }
 0x1b8   : > { %v2122_v4 = vpop.f32.mrf.mxu3  ;;  %v775_v56 = vrot.slane %v774_v47, 4 }
 0x1b9   : > { %v739_v8 = vadd.f32 %v2126_v5, %v2122_v4 }
 0x1bb   : > { %v747_v19 = vmax.f32 %v739_v8, 0.0  ;;  %v776_v8 = vadd.f32 %v775_v56, %v774_v47  ;;  %v1632_v47 = vld [vmem:[%s2420_s4 + $0x18] sm:$0xf0]  ;;  %v1676_v56 = vld [vmem:[%s2420_s4 + $0x4] sm:$0xf] }
 0x1bd   : > { %v760_v36 = vmul.f32 %v2140_v28, %v747_v19 }
 0x1bf   : > { %v781_v48 = vsel %vm766_vm1, %v760_v36, 0.0  ;;  %v777_v36 = vrot.slane %v776_v8, 2 }
 0x1c0   : > { %v2124_v49 = vpop.f32.mrf.mxu3  ;;  %v782_v57 = vrot.slane %v781_v48, 4 }
 0x1c1   : > { %v740_v12 = vadd.f32 %v2126_v5, %v2124_v49 }
 0x1c2   : > { %v783_v9 = vadd.f32 %v782_v57, %v781_v48  ;;  %v2171_v48 = vld [vmem:[%s2421_s5 + $0x8] sm:$0xff] }
 0x1c3   : > { %v748_v26 = vmax.f32 %v740_v12, 0.0  ;;  %v1624_v57 = vld [vmem:[%s2420_s4 + $0x8] sm:$0xf0]  ;;  %885 = vmatpush.bf16.msrb.mxu3 %v2171_v48 }
 0x1c5   : > { %v761_v44 = vmul.f32 %v2140_v28, %v748_v26 }
 0x1c7   : > { %v788_v54 = vsel %vm766_vm1, %v761_v44, 0.0  ;;  %886 = vmatpush.bf16.msrb.mxu3 %v2186_v62 }
 0x1c8   : > { %v2136_v20 = vpop.f32.mrf.mxu3  ;;  %v789_v63 = vrot.slane %v788_v54, 4 }
 0x1c9   : > { %v741_v27 = vadd.f32 %v2126_v5, %v2136_v20 }
 0x1ca   : > { %v790_v19 = vadd.f32 %v789_v63, %v788_v54  ;;  %v778_v63 = vadd.f32 %v777_v36, %v776_v8 }
 0x1cb   : > { %v749_v37 = vmax.f32 %v741_v27, 0.0 }
 0x1cc   : > { %v791_v54 = vrot.slane %v790_v19, 2  ;;  %v779_v8 = vrot.slane %v778_v63, 1 }
 0x1cd   : > { %v762_v46 = vmul.f32 %v2140_v28, %v749_v37  ;;  %v784_v37 = vrot.slane %v783_v9, 2 }
 0x1cf   : > { %v795_v60 = vsel %vm766_vm1, %v762_v46, 0.0  ;;  %v1678_v46 = vld [vmem:[%s2420_s4 + $0x14] sm:$0xf] }
 0x1d0   : > { %v2149_v51 = vpop.f32.mrf.mxu3  ;;  %v796_v0 = vrot.slane %v795_v60, 4 }
 0x1d1   : > { %v742_v55 = vadd.f32 %v2126_v5, %v2149_v51 }
 0x1d2   : > { %v797_v27 = vadd.f32 %v796_v0, %v795_v60 }
 0x1d3   : > { %v750_v61 = vmax.f32 %v742_v55, 0.0  ;;  %v2173_v55 = vor.u32 %v1678_v46, %v1632_v47  ;;  %v792_v46 = vadd.f32 %v791_v54, %v790_v19 }
 0x1d4   : > { %v798_v60 = vrot.slane %v797_v27, 2 }
 0x1d5   : > { %v763_v6 = vmul.f32 %v2140_v28, %v750_v61  ;;  %573 = vmatpush.bf16.msrb.mxu2 %v2173_v55 }
 0x1d6   : > { %v799_v25 = vadd.f32 %v798_v60, %v797_v27  ;;  %v780_v27 = vadd.f32 %v779_v8, %v778_v63 }
 0x1d7   : > { %v802_v12 = vsel %vm766_vm1, %v763_v6, 0.0  ;;  %v2189_v6 = vor.u32 %v1676_v56, %v1624_v57  ;;  %v793_v57 = vrot.slane %v792_v46, 1 }
 0x1d8   : > { %v803_v23 = vrot.slane %v802_v12, 4  ;;  %v2158_v26 = vpop.f32.mrf.mxu3  ;;  %v800_v19 = vrot.slane %v799_v25, 1  ;;  %v824_v21 = vpack.c.bf16 %v780_v27, %v780_v27 }
 0x1d9   : > { %v743_v29 = vadd.f32 %v2126_v5, %v2158_v26  ;;  %574 = vmatpush.bf16.msrb.mxu2 %v2189_v6 }
 0x1da   : > { %v804_v39 = vadd.f32 %v803_v23, %v802_v12  ;;  %v785_v12 = vadd.f32 %v784_v37, %v783_v9  ;;  %v840_v63 = vunpack.c.l.b16 %v824_v21 }
 0x1db   : > { %v751_v44 = vmax.f32 %v743_v29, 0.0  ;;  %v771_v29 = vadd.f32 %v770_v52, %v769_v15 }
 0x1dc   : > { %v805_v0 = vrot.slane %v804_v39, 2  ;;  %v786_v56 = vrot.slane %v785_v12, 1  ;;  %1637 = vmatmul.msk.bf16.vlgmr.msrb.gmra.mxu2 %vm488_vm0, %v2002_v14 }
 0x1dd   : > { %v764_v61 = vmul.f32 %v2140_v28, %v751_v44  ;;  %v772_v37 = vrot.slane %v771_v29, 1 }
 0x1de   : > { %v806_v36 = vadd.f32 %v805_v0, %v804_v39  ;;  %v787_v60 = vadd.f32 %v786_v56, %v785_v12  ;;  %v794_v0 = vadd.f32 %v793_v57, %v792_v46 }
 0x1df   : > { %v809_v23 = vsel %vm766_vm1, %v764_v61, 0.0  ;;  %v773_v61 = vadd.f32 %v772_v37, %v771_v29 }
 0x1e0   : > { %v810_v47 = vrot.slane %v809_v23, 4  ;;  %v2192_v44 = vpop.f32.mrf.mxu3  ;;  %v825_v16 = vpack.c.bf16 %v787_v60, %v787_v60  ;;  %v826_v10 = vpack.c.bf16 %v794_v0, %v794_v0 }
 0x1e1   : > { %v744_v24 = vadd.f32 %v2126_v5, %v2192_v44  ;;  %v807_v5 = vrot.slane %v806_v36, 1 }
 0x1e2   : > { %v811_v22 = vadd.f32 %v810_v47, %v809_v23  ;;  %v841_v12 = vunpack.c.l.b16 %v825_v16  ;;  %v842_v46 = vunpack.c.l.b16 %v826_v10 }
 0x1e3   : > { %v752_v9 = vmax.f32 %v744_v24, 0.0  ;;  %v801_v24 = vadd.f32 %v800_v19, %v799_v25  ;;  %v808_v59 = vadd.f32 %v807_v5, %v806_v36  ;;  %v1735_v5 = vld [vmem:[%s2424_s8 + $0x2] ss:$0 sm:$0xff] }
 0x1e4   : > { %v812_v15 = vrot.slane %v811_v22, 2  ;;  %924 = vrot.lane.b32.xlu0 %v1735_v5, %s1834_s18  ;;  %v2247_v5 = vld [vmem:[%s2424_s8 + $0x1] ss:$0 sm:$0xff] }
 0x1e5   : > { %v765_v52 = vmul.f32 %v2140_v28, %v752_v9  ;;  %v823_v9 = vpack.c.bf16 %v773_v61, %v773_v61  ;;  %v827_v14 = vpack.c.bf16 %v801_v24, %v801_v24  ;;  %v828_v8 = vpack.c.bf16 %v808_v59, %v808_v59 }
 0x1e6   : > { %v813_v54 = vadd.f32 %v812_v15, %v811_v22 }
 0x1e7   : > { %v816_v39 = vsel %vm766_vm1, %v765_v52, 0.0  ;;  %v839_v29 = vunpack.c.l.b16 %v823_v9  ;;  %v843_v25 = vunpack.c.l.b16 %v827_v14  ;;  %v844_v57 = vunpack.c.l.b16 %v828_v8  ;;  %v1685_v8 = vld [vmem:[%s2423_s7 + $0x8] sm:$0xff] }
 0x1e8   : > { %v814_v23 = vrot.slane %v813_v54, 1  ;;  %v817_v47 = vrot.slane %v816_v39, 4  ;;  %977 = vmatpush.bf16.msra.mxu2 %v1685_v8  ;;  %1385 = vmatpush.bf16.msrb.mxu0 %v1685_v8 }
 0x1e9   : > { %v848_v36 = vsel %vm847_vm2, %v840_v63, %v839_v29 }
 0x1ea   : > { %v818_v17 = vadd.f32 %v817_v47, %v816_v39  ;;  %v815_v11 = vadd.f32 %v814_v23, %v813_v54  ;;  %v850_v52 = vsel %vm849_vm3, %v841_v12, %v848_v36  ;;  %v1684_v12 = vld [vmem:[%s2423_s7] sm:$0xff] }
 0x1ec   : > { %v819_v43 = vrot.slane %v818_v17, 2  ;;  %v829_v56 = vpack.c.bf16 %v815_v11, %v815_v11  ;;  %978 = vmatpush.bf16.msra.mxu2 %v1684_v12  ;;  %1386 = vmatpush.bf16.msrb.mxu0 %v1684_v12 }
 0x1ee   : > { %v820_v22 = vadd.f32 %v819_v43, %v818_v17  ;;  %v845_v19 = vunpack.c.l.b16 %v829_v56  ;;  %v852_v17 = vsel %vm851_vm4, %v842_v46, %v850_v52 }
 0x1ef   : > { %v854_v11 = vsel %vm853_vm5, %v843_v25, %v852_v17 }
 0x1f0   : > { %v821_v37 = vrot.slane %v820_v22, 1  ;;  %v856_v16 = vsel %vm855_vm6, %v844_v57, %v854_v11  ;;  %1070 = vmatpush.bf16.msrb.mxu2 %v2173_v55 }
 0x1f1   : > { %v858_v59 = vsel %vm857_vm7, %v845_v19, %v856_v16 }
 0x1f2   : > { %v822_v15 = vadd.f32 %v821_v37, %v820_v22 }
 0x1f4   : > { %v830_v21 = vpack.c.bf16 %v822_v15, %v822_v15  ;;  %1071 = vmatpush.bf16.msrb.mxu2 %v2189_v6  ;;  %v1737_v6 = vld [vmem:[%s2424_s8 + $0x3] ss:$0 sm:$0xff] }
 0x1f6   : > { %v846_v10 = vunpack.c.l.b16 %v830_v21 }
 0x1f8   : > { %v860_v43 = vsel %vm859_vm8, %v846_v10, %v858_v59 }
 0x1f9   : > { %v861_v27 = vpack.c.b16 %v860_v43, %v860_v43 }
 0x1fb   : > { %862 = vrot.lane.b32.xlu1 %v861_v27, %s2455_s20 }
 0x203   : > { %948 = vrot.lane.b32.xlu1 %v1998_v13, %s1834_s18 }
 0x20b   : > { %991 = vrot.lane.b32.xlu1 %v1737_v6, %s2456_s27 }
 0x256   : > { %v2218_v23 = vpop.permute.xlu0 %924 }
 0x25f   : > { %v576_v54 = vpop.f32.mrf.mxu2 }
 0x260   : > { %918 = vrot.lane.b32.xlu2 %v576_v54, %s1834_s18 }
 0x267   : > { %v578_v39 = vpop.f32.mrf.mxu2 }
 0x26d   : > { %v863_v60 = vpop.permute.xlu1 %862 }
 0x26e   : > { %1650 = vmatmul.msk.bf16.vlgmr.msrb.gmra.mxu3 %vm488_vm0, %v863_v60 }
 0x275   : > { %v949_v15 = vpop.permute.xlu1 %948 }
 0x27d   : > { %v2240_v43 = vpop.permute.xlu1 %991 }
 0x2ba   : > { %v919_v61 = vpop.permute.xlu2 %918 }
 0x2f1   : > { %v888_v0 = vpop.f32.mrf.mxu3 }
 0x2f2   : > { %v921_v47 = vadd.f32 %v919_v61, %v888_v0 }
 0x2f4   : > { %v927_v24 = vadd.f32 %v2218_v23, %v921_v47 }
 0x2f6   : > { %v1652_v9 = vmul.f32 -1.442695, %v927_v24 }
 0x2f8   : > { %1740 = vpow2.f32 %v1652_v9 }
 0x2f9   : > { %v890_v14 = vpop.f32.mrf.mxu3 }
 0x2fe   : > { %v1741_v63 = vpop.eup %1740 }
 0x2ff   : > { %v931_v22 = vadd.f32 1.0, %v1741_v63 }
 0x301   : > { %1742 = vrcp.f32 %v931_v22  ;;  %v943_v37 = vand.u32 2147483648, %v931_v22  ;;  %v941_v36 = vand.u32 2147483647, %v931_v22  ;;  %vm937_vm10 = vweird.f32 %v931_v22 }
 0x303   : > { %v944_v19 = vor.u32 1.1754944e-38, %v943_v37  ;;  %vm942_vm12 = vcmp.eq.f32.partialorder %v941_v36, 8.507059e+37 }
 0x307   : > { %v1743_v56 = vpop.eup %1742 }
 0x308   : > { %v933_v29 = vmul.f32 %v1743_v56, %v931_v22  ;;  %vm938_vm9 = vweird.f32 %v1743_v56 }
 0x309   : > { %vm939_vm11 = vmor %vm937_vm10, %vm938_vm9 }
 0x30a   : > { %v934_v46 = vsub.f32 1.0, %v933_v29 }
 0x30c   : > { %v935_v25 = vmul.f32 %v1743_v56, %v934_v46 }
 0x30e   : > { %v936_v57 = vadd.f32 %v1743_v56, %v935_v25 }
 0x310   : > { %v940_v52 = vsel %vm939_vm11, %v1743_v56, %v936_v57 }
 0x311   : > { %v945_v21 = vsel %vm942_vm12, %v944_v19, %v940_v52  ;;  %v1835_v19 = vmov 32.0  }
 0x312   : > { %v951_v17 = vmul.f32 %v949_v15, %v945_v21 }
 0x314   : > { %v952_v11 = vpack.c.bf16 %v951_v17, %v951_v17 }
 0x316   : > { %954 = vrot.lane.b32.xlu2 %v952_v11, %s2455_s20 }
 0x31e   : > { %892 = vrot.lane.b32.xlu2 %v2049_v33, %s1834_s18 }
 0x370   : > { %v955_v55 = vpop.permute.xlu2 %954 }
 0x371   : > { %1661 = vmatmul.msk.bf16.vlgmr.msra.gmra.mxu2 %vm488_vm0, %v955_v55 }
 0x372   : > { %1311 = vmatpush.bf16.msra.mxu2 %v2171_v48 }
 0x376   : > { %1312 = vmatpush.bf16.msra.mxu2 %v2186_v62 }
 0x378   : > { %v893_v62 = vpop.permute.xlu2 %892 }
 0x379   : > { %v895_v54 = vadd.f32 %v893_v62, %v888_v0 }
 0x37b   : > { %v897_v60 = vadd.f32 %v2247_v5, %v895_v54 }
 0x37d   : > { %v1651_v39 = vmul.f32 -1.442695, %v897_v60 }
 0x3f4   : > { %v980_v10 = vpop.f32.mrf.mxu2 }
 0x3f5   : > { %985 = vrot.lane.b32.xlu0 %v980_v10, %s2456_s27 }
 0x3fc   : > { %v982_v16 = vpop.f32.mrf.mxu2 }
 0x467   : > { %v986_v59 = vpop.permute.xlu0 %985 }
 0x468   : > { %v988_v33 = vadd.f32 %v986_v59, %v888_v0 }
 0x46a   : > { %v994_v27 = vadd.f32 %v2240_v43, %v988_v33 }
 0x46c   : > { %1744 = vtanh.f32 %v994_v27 }
 0x46d   : > { %1746 = vpow2.f32 %v1651_v39 }
 0x472   : > { %v1745_v48 = vpop.eup %1744 }
 0x473   : > { %998 = vrot.lane.b32.xlu0 %v1745_v48, %s2456_s27  ;;  %v1747_v61 = vpop.eup %1746 }
 0x474   : > { %v901_v47 = vadd.f32 1.0, %v1747_v61 }
 0x476   : > { %1748 = vrcp.f32 %v901_v47  ;;  %v913_v22 = vand.u32 2147483648, %v901_v47  ;;  %vm907_vm14 = vweird.f32 %v901_v47  ;;  %v911_v12 = vand.u32 2147483647, %v901_v47 }
 0x477   : > { %1750 = vrcp.f32 %v1835_v19 }
 0x478   : > { %v914_v29 = vor.u32 1.1754944e-38, %v913_v22  ;;  %vm912_vm9 = vcmp.eq.f32.partialorder %v911_v12, 8.507059e+37  ;;  %v2265_v22 = vld [vmem:[%s2424_s8 + $0x6] ss:$0 sm:$0xff] }
 0x47c   : > { %v1749_v24 = vpop.eup %1748 }
 0x47d   : > { %v903_v9 = vmul.f32 %v1749_v24, %v901_v47  ;;  %vm908_vm13 = vweird.f32 %v1749_v24  ;;  %v1751_v52 = vpop.eup %1750 }
 0x47e   : > { %vm909_vm15 = vmor %vm907_vm14, %vm908_vm13  ;;  %v1008_v21 = vmul.f32 32.0, %v1751_v52  ;;  %vm1012_vm10 = vweird.f32 %v1751_v52 }
 0x47f   : > { %v904_v14 = vsub.f32 1.0, %v903_v9 }
 0x480   : > { %v1009_v17 = vsub.f32 1.0, %v1008_v21 }
 0x481   : > { %v905_v63 = vmul.f32 %v1749_v24, %v904_v14  ;;  %v2260_v14 = vld [vmem:[%s2424_s8 + $0x5] ss:$0 sm:$0xff] }
 0x482   : > { %v1010_v11 = vmul.f32 %v1751_v52, %v1009_v17 }
 0x483   : > { %v906_v8 = vadd.f32 %v1749_v24, %v905_v63 }
 0x484   : > { %v1011_v55 = vadd.f32 %v1751_v52, %v1010_v11 }
 0x485   : > { %v910_v56 = vsel %vm909_vm15, %v1749_v24, %v906_v8 }
 0x486   : > { %v915_v0 = vsel %vm912_vm9, %v914_v29, %v910_v56  ;;  %v2252_v6 = vsel %vm1012_vm10, %v1751_v52, %v1011_v55 }
 0x487   : > { %v996_v46 = vsub.f32 1.0, %v915_v0  ;;  %v1002_v36 = vmul.f32 %v915_v0, %v1998_v13 }
 0x4e5   : > { %v999_v37 = vpop.permute.xlu0 %998 }
 0x4e6   : > { %v1001_v25 = vmul.f32 %v999_v37, %v996_v46 }
 0x4e8   : > { %v1003_v57 = vadd.f32 %v1002_v36, %v1001_v25 }
 0x4ea   : > { %v1004_v15 = vsel %vm488_vm0, %v1003_v57, 0.0 }
 0x4eb   : > { %1005 = vadd.xlane.f32.xlu1 %v1004_v15 }
 0x55e   : > { %v1006_v10 = vpop.xlane.xlu1 %1005 }
 0x55f   : > { %v1014_v16 = vmul.f32 %v2252_v6, %v1006_v10 }
 0x561   : > { %v1015_v59 = vsub.f32 %v1003_v57, %v1014_v16 }
 0x563   : > { %v1016_v33 = vmul.f32 %v1015_v59, %v1015_v59 }
 0x565   : > { %v1017_v27 = vsel %vm488_vm0, %v1016_v33, 0.0 }
 0x566   : > { %1018 = vadd.xlane.f32.xlu2 %v1017_v27 }
 0x5d9   : > { %v1019_v48 = vpop.xlane.xlu2 %1018 }
 0x5da   : > { %v1020_v62 = vmul.f32 %v1019_v48, %v2252_v6 }
 0x5dc   : > { %v1021_v54 = vadd.f32 1e-05, %v1020_v62 }
 0x5de   : > { %1752 = vrsqrt.f32 %v1021_v54  ;;  %vm1028_vm12 = vweird.f32 %v1021_v54 }
 0x5e4   : > { %v1753_v60 = vpop.eup %1752 }
 0x5e5   : > { %v1023_v39 = vmul.f32 %v1753_v60, %v1021_v54  ;;  %vm1029_vm11 = vweird.f32 %v1753_v60 }
 0x5e6   : > { %vm1030_vm13 = vmor %vm1028_vm12, %vm1029_vm11 }
 0x5e7   : > { %v1024_v61 = vmul.f32 %v1753_v60, %v1023_v39  ;;  %v1041_v39 = vadd.f32 %v2122_v4, %v2076_v45 }
 0x5e9   : > { %v1025_v47 = vmul.f32 0.5, %v1024_v61  ;;  %v1042_v61 = vadd.f32 %v2124_v49, %v2080_v53 }
 0x5eb   : > { %v1026_v24 = vsub.f32 1.5, %v1025_v47  ;;  %v1043_v47 = vadd.f32 %v2136_v20, %v2089_v2 }
 0x5ed   : > { %v1027_v9 = vmul.f32 %v1753_v60, %v1026_v24  ;;  %v1044_v24 = vadd.f32 %v2149_v51, %v2095_v18 }
 0x5ef   : > { %v1031_v63 = vsel %vm1030_vm13, %v1753_v60, %v1027_v9  ;;  %v1039_v60 = vadd.f32 %v2118_v1, %v2065_v40  ;;  %v1045_v9 = vadd.f32 %v2158_v26, %v2100_v35  ;;  %v1046_v40 = vadd.f32 %v2192_v44, %v2106_v50 }
 0x5f0   : > { %v1032_v8 = vmul.f32 %v1031_v63, %v1015_v59 }
 0x5f2   : > { %v1034_v12 = vmul.f32 %v2260_v14, %v1032_v8 }
 0x5f4   : > { %v1036_v56 = vadd.f32 %v2265_v22, %v1034_v12 }
 0x5f6   : > { %v1037_v29 = vmul.f32 %v1036_v56, %v2140_v28 }
 0x5f8   : > { %v2271_v0 = vadd.f32 %v1037_v29, %v1998_v13 }
 0x5fa   : > { %v1047_v46 = vpack.c.bf16 %v2271_v0, %v2271_v0 }
 0x5fc   : > { %1662 = vmatmul.msk.bf16.vlgmr.msra.gmra.mxu1 %vm488_vm0, %v1047_v46  ;;  %1663 = vmatmul.msk.bf16.vlgmr.msrb.gmra.mxu2 %vm488_vm0, %v1047_v46 }
 0x679   : > { %v2277_v37 = vpop.f32.mrf.mxu1 }
 0x67a   : > { %1112 = vrot.lane.b32.xlu0 %v2277_v37, %s2455_s20  ;;  %v1078_v36 = vadd.f32 %v2277_v37, %v2053_v34  ;;  %v1077_v15 = vadd.f32 %v2070_v41, %v2277_v37  ;;  %v1040_v41 = vadd.f32 %v2120_v3, %v2072_v42 }
 0x67c   : > { %v1080_v19 = vrot.slane %v1077_v15, 1  ;;  %v1081_v52 = vrot.slane %v1077_v15, 2  ;;  %v1082_v21 = vrot.slane %v1077_v15, 3  ;;  %v1083_v17 = vrot.slane %v1077_v15, 4 }
 0x67d   : > { %v1084_v11 = vrot.slane %v1077_v15, 5  ;;  %v1085_v55 = vrot.slane %v1077_v15, 6  ;;  %v1086_v10 = vrot.slane %v1077_v15, 7  ;;  %v1087_v16 = vperm.slane %v1077_v15, 0 }
 0x67e   : > { %v1088_v59 = vperm.slane %v1080_v19, 0  ;;  %v1089_v33 = vperm.slane %v1081_v52, 0  ;;  %v1090_v27 = vperm.slane %v1082_v21, 0  ;;  %v1091_v48 = vperm.slane %v1083_v17, 0 }
 0x67f   : > { %v2281_v25 = vpop.f32.mrf.mxu2  ;;  %v1092_v34 = vperm.slane %v1084_v11, 0  ;;  %v1093_v62 = vperm.slane %v1085_v55, 0  ;;  %v1094_v54 = vperm.slane %v1086_v10, 0  ;;  %v1103_v1 = vadd.f32 %v1087_v16, %v1039_v60  ;;  %v2457_v10 = vld [vmem:[#allocation14_spill] sm:$0xff]  ;;  %v2462_v60 = vld [vmem:[#allocation13_spill] sm:$0xff] }
 0x680   : > { %v1104_v42 = vadd.f32 %v1088_v59, %v1040_v41  ;;  %v1105_v3 = vadd.f32 %v1089_v33, %v1041_v39  ;;  %v1106_v63 = vadd.f32 %v1090_v27, %v1042_v61  ;;  %v1107_v4 = vadd.f32 %v1091_v48, %v1043_v47  ;;  %v2458_v33 = vld [vmem:[#allocation5_spill] sm:$0xff]  ;;  %v2464_v39 = vld [vmem:[#allocation10_spill] sm:$0xff]  ;;  %v2465_v47 = vld [vmem:[#allocation11_spill] sm:$0xff] }
 0x681   : > { %v1062_v57 = vpop.f32.mrf.mxu1  ;;  %v1108_v8 = vadd.f32 %v1092_v34, %v1044_v24  ;;  %v1109_v53 = vadd.f32 %v1093_v62, %v1045_v9  ;;  %v1110_v49 = vadd.f32 %v1094_v54, %v1046_v40  ;;  %v2460_v34 = vld [vmem:[#allocation7_spill] sm:$0xff]  ;;  %v2461_v62 = vld [vmem:[#allocation8_spill] sm:$0xff] }
 0x682   : > { %1185 = vrot.lane.b32.xlu0 %v1078_v36, %s2455_s20  ;;  %v2466_v9 = vld [vmem:[#allocation12_spill] sm:$0xff] }
 0x687   : > { %v1075_v13 = vpop.f32.mrf.mxu2 }
 0x6ec   : > { %v1113_v45 = vpop.permute.xlu0 %1112 }
 0x6ed   : > { %v1115_v12 = vadd.f32 %v1113_v45, %v1103_v1  ;;  %v1116_v2 = vadd.f32 %v1113_v45, %v1104_v42  ;;  %v1117_v20 = vadd.f32 %v1113_v45, %v1105_v3  ;;  %v1118_v56 = vadd.f32 %v1113_v45, %v1106_v63 }
 0x6ee   : > { %v1119_v18 = vadd.f32 %v1113_v45, %v1107_v4  ;;  %v1120_v51 = vadd.f32 %v1113_v45, %v1108_v8  ;;  %v1121_v35 = vadd.f32 %v1113_v45, %v1109_v53  ;;  %v1122_v26 = vadd.f32 %v1113_v45, %v1110_v49 }
 0x6ef   : > { %v1123_v29 = vmax.f32 %v1115_v12, 0.0  ;;  %v1124_v50 = vmax.f32 %v1116_v2, 0.0  ;;  %v1125_v44 = vmax.f32 %v1117_v20, 0.0  ;;  %v1126_v46 = vmax.f32 %v1118_v56, 0.0 }
 0x6f0   : > { %v1127_v36 = vmax.f32 %v1119_v18, 0.0  ;;  %v1128_v57 = vmax.f32 %v1120_v51, 0.0  ;;  %v1129_v13 = vmax.f32 %v1121_v35, 0.0  ;;  %v1130_v15 = vmax.f32 %v1122_v26, 0.0 }
 0x6f1   : > { %v1131_v19 = vmul.f32 %v1123_v29, %v2082_v58  ;;  %v1132_v52 = vmul.f32 %v1124_v50, %v2043_v30  ;;  %v1133_v21 = vmul.f32 %v1125_v44, %v2045_v31  ;;  %v1134_v17 = vmul.f32 %v1126_v46, %v2091_v7  ;;  %v2459_v58 = vld [vmem:[#allocation6_spill] sm:$0xff] }
 0x6f2   : > { %v1135_v11 = vmul.f32 %v1127_v36, %v2102_v38  ;;  %v1136_v55 = vmul.f32 %v1128_v57, %v2047_v32  ;;  %v1137_v16 = vmul.f32 %v1129_v13, %v2457_v10  ;;  %v1138_v41 = vmul.f32 %v1130_v15, %v2462_v60  ;;  %v2463_v32 = vld [vmem:[#allocation9_spill] sm:$0xff] }
 0x6f3   : > { %v1139_v59 = vpack.c.bf16 %v1132_v52, %v1131_v19  ;;  %v1433_v27 = vadd.f32 %v1131_v19, %v2458_v33  ;;  %v1434_v48 = vadd.f32 %v1132_v52, %v2459_v58  ;;  %v1140_v30 = vpack.c.bf16 %v1134_v17, %v1133_v21 }
 0x6f4   : > { %v1435_v31 = vadd.f32 %v1133_v21, %v2460_v34  ;;  %v1436_v7 = vadd.f32 %v1134_v17, %v2461_v62  ;;  %v1141_v54 = vpack.c.bf16 %v1136_v55, %v1135_v11  ;;  %v1437_v38 = vadd.f32 %v1135_v11, %v2463_v32  ;;  %v1186_v4 = vpop.permute.xlu0 %1185 }
 0x6f5   : > { %1664 = vmatmul.msk.bf16.vlgmr.msrb.gmra.mxu1 %vm488_vm0, %v1139_v59  ;;  %1442 = vst.msk [vmem:[%s428_s17] sm:$0xff] %vm488_vm0, %v1433_v27  ;;  %v1438_v61 = vadd.f32 %v1136_v55, %v2464_v39  ;;  %v1439_v24 = vadd.f32 %v1137_v16, %v2465_v47  ;;  %v1440_v40 = vadd.f32 %v1138_v41, %v2466_v9 }
 0x6f6   : > { %1443 = vst.msk [vmem:[%s428_s17 + $0x8] sm:$0xff] %vm488_vm0, %v1434_v48  ;;  %v1142_v1 = vpack.c.bf16 %v1138_v41, %v1137_v16 }
 0x6f7   : > { %1444 = vst.msk [vmem:[%s428_s17 + $0x10] sm:$0xff] %vm488_vm0, %v1435_v31 }
 0x6f8   : > { %1445 = vst.msk [vmem:[%s428_s17 + $0x18] sm:$0xff] %vm488_vm0, %v1436_v7 }
 0x6f9   : > { %1446 = vst.msk [vmem:[%s428_s17 + $0x20] sm:$0xff] %vm488_vm0, %v1437_v38 }
 0x6fa   : > { %1447 = vst.msk [vmem:[%s428_s17 + $0x28] sm:$0xff] %vm488_vm0, %v1438_v61 }
 0x6fb   : > { %1448 = vst.msk [vmem:[%s428_s17 + $0x30] sm:$0xff] %vm488_vm0, %v1439_v24 }
 0x6fc   : > { %1449 = vst.msk [vmem:[%s428_s17 + $0x38] sm:$0xff] %vm488_vm0, %v1440_v40  ;;  %s1781_s17 = sshra.s32 %s1471_s30, 4  ;;  %s1782_s17 = int_to_ptr.hbm [resolvable:$true] %s1781_s17 }
 0x6fd   : > { %s1783_s0 = scalar_lea.hbm %s1782_s17, 8  ;;  %p1788_p1 = scmp.lt.s32.totalorder %s1782_s17, %s2425_s9 }
 0x6fe   : > { %p1784_p12 = scmp.ne.s32.totalorder %s1782_s17, %s1783_s0 }
 0x700   : > { %p1785_p13 = pnand %p1784_p12, %p1929_p5 }
 0x702   : > { %p1786_p0 = pneg %p1785_p13 }
 0x705   : > { %1665 = vmatmul.msk.bf16.gmra.mxu1 %vm488_vm0, %v1140_v30 }
 0x715   : > { %1666 = vmatmul.msk.bf16.gmra.mxu1 %vm488_vm0, %v1141_v54 }
 0x725   : > { %1667 = vmatmul.msk.bf16.gmra.mxu1 %vm488_vm0, %v1142_v1 }
 0x772   : > { %v1164_v42 = vpop.f32.mrf.mxu1 }
 0x773   : > { %v1188_v49 = vadd.f32 %v1186_v4, %v1164_v42 }
 0x775   : > { %v1196_v18 = vmax.f32 %v1188_v49, 0.0 }
 0x777   : > { %v1204_v44 = vmul.f32 %v1196_v18, %v2140_v28 }
 0x779   : > { %v1212_v19 = vsel %vm766_vm1, %v1204_v44, 0.0 }
 0x77a   : > { %v1166_v3 = vpop.f32.mrf.mxu1  ;;  %v1213_v16 = vrot.slane %v1212_v19, 4 }
 0x77b   : > { %v1189_v8 = vadd.f32 %v1186_v4, %v1166_v3 }
 0x77c   : > { %v1214_v34 = vadd.f32 %v1213_v16, %v1212_v19 }
 0x77d   : > { %v1197_v2 = vmax.f32 %v1189_v8, 0.0 }
 0x77e   : > { %v1215_v61 = vrot.slane %v1214_v34, 2 }
 0x77f   : > { %v1205_v26 = vmul.f32 %v1197_v2, %v2140_v28 }
 0x781   : > { %v1219_v57 = vsel %vm766_vm1, %v1205_v26, 0.0 }
 0x782   : > { %v1169_v63 = vpop.f32.mrf.mxu1  ;;  %v1220_v17 = vrot.slane %v1219_v57, 4 }
 0x783   : > { %v1190_v53 = vadd.f32 %v1186_v4, %v1169_v63  ;;  %v1216_v63 = vadd.f32 %v1215_v61, %v1214_v34 }
 0x784   : > { %v1221_v58 = vadd.f32 %v1220_v17, %v1219_v57 }
 0x785   : > { %v1198_v20 = vmax.f32 %v1190_v53, 0.0 }
 0x786   : > { %v1222_v41 = vrot.slane %v1221_v58, 2 }
 0x787   : > { %v1206_v50 = vmul.f32 %v1198_v20, %v2140_v28 }
 0x788   : > { %v1223_v40 = vadd.f32 %v1222_v41, %v1221_v58 }
 0x789   : > { %v1226_v13 = vsel %vm766_vm1, %v1206_v50, 0.0 }
 0x78a   : > { %v1171_v45 = vpop.f32.mrf.mxu1  ;;  %v1227_v55 = vrot.slane %v1226_v13, 4  ;;  %v1224_v2 = vrot.slane %v1223_v40, 1 }
 0x78b   : > { %v1191_v12 = vadd.f32 %v1186_v4, %v1171_v45 }
 0x78c   : > { %v1228_v48 = vadd.f32 %v1227_v55, %v1226_v13 }
 0x78d   : > { %v1199_v51 = vmax.f32 %v1191_v12, 0.0 }
 0x78e   : > { %v1229_v38 = vrot.slane %v1228_v48, 2 }
 0x78f   : > { %v1207_v46 = vmul.f32 %v1199_v51, %v2140_v28 }
 0x790   : > { %v1230_v42 = vadd.f32 %v1229_v38, %v1228_v48 }
 0x791   : > { %v1233_v52 = vsel %vm766_vm1, %v1207_v46, 0.0  ;;  %v1225_v46 = vadd.f32 %v1224_v2, %v1223_v40 }
 0x792   : > { %v1174_v56 = vpop.f32.mrf.mxu1  ;;  %v1234_v59 = vrot.slane %v1233_v52, 4  ;;  %v1231_v18 = vrot.slane %v1230_v42, 1 }
 0x793   : > { %v1192_v35 = vadd.f32 %v1186_v4, %v1174_v56 }
 0x794   : > { %v1235_v31 = vadd.f32 %v1234_v59, %v1233_v52  ;;  %v1232_v13 = vadd.f32 %v1231_v18, %v1230_v42 }
 0x795   : > { %v1200_v29 = vmax.f32 %v1192_v35, 0.0  ;;  %v1217_v35 = vrot.slane %v1216_v63, 1 }
 0x796   : > { %v1236_v47 = vrot.slane %v1235_v31, 2  ;;  %v1270_v16 = vpack.c.bf16 %v1232_v13, %v1232_v13 }
 0x797   : > { %v1208_v36 = vmul.f32 %v1200_v29, %v2140_v28  ;;  %v1218_v19 = vadd.f32 %v1217_v35, %v1216_v63 }
 0x798   : > { %v1237_v45 = vadd.f32 %v1236_v47, %v1235_v31 }
 0x799   : > { %v1240_v11 = vsel %vm766_vm1, %v1208_v36, 0.0 }
 0x79a   : > { %v1176_v15 = vpop.f32.mrf.mxu1  ;;  %v1241_v33 = vrot.slane %v1240_v11, 4  ;;  %v1238_v26 = vrot.slane %v1237_v45, 1 }
 0x79b   : > { %v1193_v21 = vadd.f32 %v1186_v4, %v1176_v15 }
 0x79c   : > { %v1242_v54 = vadd.f32 %v1241_v33, %v1240_v11  ;;  %v1239_v52 = vadd.f32 %v1238_v26, %v1237_v45  ;;  %v1269_v11 = vpack.c.bf16 %v1225_v46, %v1225_v46  ;;  %v1268_v33 = vpack.c.bf16 %v1218_v19, %v1218_v19 }
 0x79d   : > { %v1201_v10 = vmax.f32 %v1193_v21, 0.0 }
 0x79e   : > { %v1243_v24 = vrot.slane %v1242_v54, 2 }
 0x79f   : > { %v1209_v27 = vmul.f32 %v1201_v10, %v2140_v28 }
 0x7a0   : > { %v1244_v49 = vadd.f32 %v1243_v24, %v1242_v54  ;;  %v1284_v54 = vunpack.c.l.b16 %v1268_v33 }
 0x7a1   : > { %v1247_v30 = vsel %vm766_vm1, %v1209_v27, 0.0  ;;  %v1271_v27 = vpack.c.bf16 %v1239_v52, %v1239_v52 }
 0x7a2   : > { %v1248_v62 = vrot.slane %v1247_v30, 4  ;;  %v1179_v7 = vpop.f32.mrf.mxu1  ;;  %v1245_v50 = vrot.slane %v1244_v49, 1 }
 0x7a3   : > { %v1194_v60 = vadd.f32 %v1186_v4, %v1179_v7 }
 0x7a4   : > { %v1249_v32 = vadd.f32 %v1248_v62, %v1247_v30  ;;  %v1246_v17 = vadd.f32 %v1245_v50, %v1244_v49  ;;  %v1285_v30 = vunpack.c.l.b16 %v1269_v11  ;;  %v1286_v62 = vunpack.c.l.b16 %v1270_v16 }
 0x7a5   : > { %v1202_v39 = vmax.f32 %v1194_v60, 0.0  ;;  %v1287_v60 = vunpack.c.l.b16 %v1271_v27 }
 0x7a6   : > { %v1250_v1 = vrot.slane %v1249_v32, 2  ;;  %v1272_v48 = vpack.c.bf16 %v1246_v17, %v1246_v17  ;;  %v1292_v38 = vsel %vm847_vm2, %v1285_v30, %v1284_v54 }
 0x7a7   : > { %v1210_v9 = vmul.f32 %v1202_v39, %v2140_v28  ;;  %v1293_v24 = vsel %vm849_vm3, %v1286_v62, %v1292_v38 }
 0x7a8   : > { %v1251_v20 = vadd.f32 %v1250_v1, %v1249_v32  ;;  %v1288_v32 = vunpack.c.l.b16 %v1272_v48  ;;  %v1294_v40 = vsel %vm851_vm4, %v1287_v60, %v1293_v24 }
 0x7a9   : > { %v1254_v3 = vsel %vm766_vm1, %v1210_v9, 0.0 }
 0x7aa   : > { %v1255_v8 = vrot.slane %v1254_v3, 4  ;;  %v1181_v53 = vpop.f32.mrf.mxu1  ;;  %v1252_v36 = vrot.slane %v1251_v20, 1  ;;  %v1295_v1 = vsel %vm853_vm5, %v1288_v32, %v1294_v40 }
 0x7ab   : > { %v1195_v12 = vadd.f32 %v1186_v4, %v1181_v53 }
 0x7ac   : > { %v1256_v56 = vadd.f32 %v1255_v8, %v1254_v3  ;;  %v1253_v55 = vadd.f32 %v1252_v36, %v1251_v20 }
 0x7ad   : > { %v1203_v51 = vmax.f32 %v1195_v12, 0.0 }
 0x7ae   : > { %v1257_v29 = vrot.slane %v1256_v56, 2  ;;  %v1273_v34 = vpack.c.bf16 %v1253_v55, %v1253_v55 }
 0x7af   : > { %v1211_v44 = vmul.f32 %v1203_v51, %v2140_v28 }
 0x7b0   : > { %v1258_v57 = vadd.f32 %v1257_v29, %v1256_v56  ;;  %v1289_v39 = vunpack.c.l.b16 %v1273_v34 }
 0x7b1   : > { %v1261_v15 = vsel %vm766_vm1, %v1211_v44, 0.0 }
 0x7b2   : > { %v1259_v4 = vrot.slane %v1258_v57, 1  ;;  %v1262_v21 = vrot.slane %v1261_v15, 4  ;;  %v1296_v3 = vsel %vm855_vm6, %v1289_v39, %v1295_v1 }
 0x7b4   : > { %v1263_v10 = vadd.f32 %v1262_v21, %v1261_v15  ;;  %v1260_v59 = vadd.f32 %v1259_v4, %v1258_v57 }
 0x7b6   : > { %v1264_v58 = vrot.slane %v1263_v10, 2  ;;  %v1274_v7 = vpack.c.bf16 %v1260_v59, %v1260_v59 }
 0x7b8   : > { %v1265_v31 = vadd.f32 %v1264_v58, %v1263_v10  ;;  %v1290_v47 = vunpack.c.l.b16 %v1274_v7 }
 0x7ba   : > { %v1266_v41 = vrot.slane %v1265_v31, 1  ;;  %v1297_v63 = vsel %vm857_vm7, %v1290_v47, %v1296_v3 }
 0x7bc   : > { %v1267_v61 = vadd.f32 %v1266_v41, %v1265_v31 }
 0x7be   : > { %v1275_v9 = vpack.c.bf16 %v1267_v61, %v1267_v61 }
 0x7c0   : > { %v1291_v42 = vunpack.c.l.b16 %v1275_v9 }
 0x7c2   : > { %v1298_v45 = vsel %vm859_vm8, %v1291_v42, %v1297_v63 }
 0x7c3   : > { %v1299_v8 = vpack.c.b16 %v1298_v45, %v1298_v45 }
 0x7c5   : > { %1300 = vrot.lane.b32.xlu0 %v1299_v8, %s2455_s20 }
 0x7cd   : > { %1343 = vrot.lane.b32.xlu0 %v2281_v25, %s1834_s18 }
 0x7d5   : > { %1368 = vrot.lane.b32.xlu0 %v2271_v0, %s1834_s18 }
 0x7dd   : > { %1318 = vrot.lane.b32.xlu0 %v2277_v37, %s1834_s18  ;;  %s1787_s18 = scalar_lea.hbm %s2425_s9, 16 }
 0x7de   : > { %p1789_p2 = scmp.lt.s32.totalorder %s1787_s18, %s1783_s0 }
 0x7e0   : > { %p1790_p3 = por %p1789_p2, %p1788_p1 }
 0x7e2   : > { %p1791_p4 = pnand %p1790_p3, %p1786_p0 }
 0x837   : > { %v1301_v53 = vpop.permute.xlu0 %1300 }
 0x838   : > { %1668 = vmatmul.msk.bf16.vlgmr.msra.gmra.mxu2 %vm488_vm0, %v1301_v53 }
 0x83f   : > { %v1344_v49 = vpop.permute.xlu0 %1343 }
 0x8bb   : > { %v1314_v12 = vpop.f32.mrf.mxu2 }
 0x8bc   : > { %v1346_v2 = vadd.f32 %v1344_v49, %v1314_v12 }
 0x8be   : > { %v1347_v20 = vadd.f32 %v1346_v2, %v2218_v23  ;;  %v1369_v23 = vpop.permute.xlu0 %1368 }
 0x8c0   : > { %v1670_v56 = vmul.f32 -1.442695, %v1347_v20 }
 0x8c2   : > { %1754 = vpow2.f32 %v1670_v56 }
 0x8c3   : > { %v1316_v18 = vpop.f32.mrf.mxu2 }
 0x8c6   : > { %v1319_v16 = vpop.permute.xlu0 %1318 }
 0x8c7   : > { %v1321_v59 = vadd.f32 %v1319_v16, %v1314_v12 }
 0x8c8   : > { %v1755_v51 = vpop.eup %1754 }
 0x8c9   : > { %v1351_v35 = vadd.f32 1.0, %v1755_v51  ;;  %v1322_v33 = vadd.f32 %v2247_v5, %v1321_v59 }
 0x8cb   : > { %1756 = vrcp.f32 %v1351_v35  ;;  %v1363_v50 = vand.u32 2147483648, %v1351_v35  ;;  %v1361_v37 = vand.u32 2147483647, %v1351_v35  ;;  %vm1357_vm2 = vweird.f32 %v1351_v35 }
 0x8cc   : > { %v1669_v27 = vmul.f32 -1.442695, %v1322_v33 }
 0x8cd   : > { %v1364_v36 = vor.u32 1.1754944e-38, %v1363_v50  ;;  %vm1362_vm4 = vcmp.eq.f32.partialorder %v1361_v37, 8.507059e+37 }
 0x8d1   : > { %v1757_v25 = vpop.eup %1756 }
 0x8d2   : > { %v1353_v26 = vmul.f32 %v1757_v25, %v1351_v35  ;;  %vm1358_vm1 = vweird.f32 %v1757_v25 }
 0x8d3   : > { %vm1359_vm3 = vmor %vm1357_vm2, %vm1358_vm1 }
 0x8d4   : > { %v1354_v29 = vsub.f32 1.0, %v1353_v26 }
 0x8d6   : > { %v1355_v44 = vmul.f32 %v1757_v25, %v1354_v29 }
 0x8d8   : > { %v1356_v46 = vadd.f32 %v1757_v25, %v1355_v44 }
 0x8da   : > { %v1360_v57 = vsel %vm1359_vm3, %v1757_v25, %v1356_v46  ;;  %v1766_v25 = vld [vmem:[%s1993_s29] sm:$0xff] }
 0x8db   : > { %v1365_v13 = vsel %vm1362_vm4, %v1364_v36, %v1360_v57 }
 0x8dc   : > { %v1371_v15 = vmul.f32 %v1369_v23, %v1365_v13 }
 0x8de   : > { %v1372_v19 = vpack.c.bf16 %v1371_v15, %v1371_v15 }
 0x8e0   : > { %1374 = vrot.lane.b32.xlu2 %v1372_v19, %s2455_s20  ;;  %s1599_s20 = sshll.u32 %s394_s28, 3 }
 0x8e1   : > { %s396_s25 = scalar_lea.vmem [#allocation2], %s1599_s20 }
 0x8e2   : > { %s1468_s26 = sshll.u32 %s396_s25, 4  ;;  %s1469_s26 = int_to_ptr.vmem [resolvable:$true] %s1468_s26 }
 0x93a   : > { %v1375_v52 = vpop.permute.xlu2 %1374 }
 0x93b   : > { %1671 = vmatmul.msk.bf16.vlgmr.msrb.gmra.mxu0 %vm488_vm0, %v1375_v52 }
 0x9b8   : > { %v1388_v4 = vpop.f32.mrf.mxu0 }
 0x9b9   : > { %1393 = vrot.lane.b32.xlu1 %v1388_v4, %s2456_s27 }
 0x9c0   : > { %v1390_v21 = vpop.f32.mrf.mxu0 }
 0xa2b   : > { %v1394_v17 = vpop.permute.xlu1 %1393 }
 0xa2c   : > { %v1396_v11 = vadd.f32 %v1394_v17, %v1314_v12 }
 0xa2e   : > { %v1397_v55 = vadd.f32 %v1396_v11, %v2240_v43 }
 0xa30   : > { %1758 = vtanh.f32 %v1397_v55 }
 0xa31   : > { %1760 = vpow2.f32 %v1669_v27 }
 0xa36   : > { %v1759_v10 = vpop.eup %1758 }
 0xa37   : > { %1401 = vrot.lane.b32.xlu0 %v1759_v10, %s2456_s27  ;;  %v1761_v58 = vpop.eup %1760 }
 0xa38   : > { %v1326_v48 = vadd.f32 1.0, %v1761_v58 }
 0xa3a   : > { %1762 = vrcp.f32 %v1326_v48  ;;  %v1338_v43 = vand.u32 2147483648, %v1326_v48  ;;  %vm1332_vm6 = vweird.f32 %v1326_v48  ;;  %v1336_v54 = vand.u32 2147483647, %v1326_v48 }
 0xa3c   : > { %v1339_v41 = vor.u32 1.1754944e-38, %v1338_v43  ;;  %vm1337_vm8 = vcmp.eq.f32.partialorder %v1336_v54, 8.507059e+37 }
 0xa40   : > { %v1763_v30 = vpop.eup %1762 }
 0xa41   : > { %v1328_v34 = vmul.f32 %v1763_v30, %v1326_v48  ;;  %vm1333_vm5 = vweird.f32 %v1763_v30 }
 0xa42   : > { %vm1334_vm7 = vmor %vm1332_vm6, %vm1333_vm5 }
 0xa43   : > { %v1329_v31 = vsub.f32 1.0, %v1328_v34 }
 0xa45   : > { %v1330_v62 = vmul.f32 %v1763_v30, %v1329_v31 }
 0xa47   : > { %v1331_v7 = vadd.f32 %v1763_v30, %v1330_v62 }
 0xa49   : > { %v1335_v60 = vsel %vm1334_vm7, %v1763_v30, %v1331_v7 }
 0xa4a   : > { %v1340_v32 = vsel %vm1337_vm8, %v1339_v41, %v1335_v60 }
 0xa4b   : > { %v1399_v5 = vsub.f32 1.0, %v1340_v32  ;;  %v1405_v61 = vmul.f32 %v1340_v32, %v2271_v0 }
 0xaa9   : > { %v1402_v38 = vpop.permute.xlu0 %1401 }
 0xaaa   : > { %v1404_v39 = vmul.f32 %v1402_v38, %v1399_v5 }
 0xaac   : > { %v1406_v47 = vadd.f32 %v1405_v61, %v1404_v39 }
 0xaae   : > { %v1407_v24 = vsel %vm488_vm0, %v1406_v47, 0.0 }
 0xaaf   : > { %1408 = vadd.xlane.f32.xlu0 %v1407_v24 }
 0xb22   : > { %v1409_v9 = vpop.xlane.xlu0 %1408 }
 0xb23   : > { %v1410_v40 = vmul.f32 %v1409_v9, %v2252_v6 }
 0xb25   : > { %v1411_v1 = vsub.f32 %v1406_v47, %v1410_v40 }
 0xb27   : > { %v1412_v42 = vmul.f32 %v1411_v1, %v1411_v1 }
 0xb29   : > { %v1413_v3 = vsel %vm488_vm0, %v1412_v42, 0.0 }
 0xb2a   : > { %1414 = vadd.xlane.f32.xlu2 %v1413_v3 }
 0xb9d   : > { %v1415_v63 = vpop.xlane.xlu2 %1414 }
 0xb9e   : > { %v1416_v45 = vmul.f32 %v1415_v63, %v2252_v6 }
 0xba0   : > { %v1417_v8 = vadd.f32 1e-05, %v1416_v45 }
 0xba2   : > { %1764 = vrsqrt.f32 %v1417_v8  ;;  %vm1424_vm15 = vweird.f32 %v1417_v8 }
 0xba8   : > { %v1765_v0 = vpop.eup %1764 }
 0xba9   : > { %v1419_v53 = vmul.f32 %v1765_v0, %v1417_v8  ;;  %vm1425_vm14 = vweird.f32 %v1765_v0 }
 0xbaa   : > { %vm1426_vm9 = vmor %vm1424_vm15, %vm1425_vm14 }
 0xbab   : > { %v1420_v49 = vmul.f32 %v1765_v0, %v1419_v53 }
 0xbad   : > { %v1421_v12 = vmul.f32 0.5, %v1420_v49 }
 0xbaf   : > { %v1422_v2 = vsub.f32 1.5, %v1421_v12 }
 0xbb1   : > { %v1423_v20 = vmul.f32 %v1765_v0, %v1422_v2 }
 0xbb3   : > { %v1427_v56 = vsel %vm1426_vm9, %v1765_v0, %v1423_v20 }
 0xbb4   : > { %v1428_v18 = vmul.f32 %v1427_v56, %v1411_v1 }
 0xbb6   : > { %v1429_v51 = vmul.f32 %v2260_v14, %v1428_v18 }
 0xbb8   : > { %v1430_v6 = vadd.f32 %v2265_v22, %v1429_v51 }
 0xbba   : > { %v1431_v35 = vmul.f32 %v1430_v6, %v2140_v28 }
 0xbbc   : > { %v1432_v26 = vadd.f32 %v1766_v25, %v1431_v35 }
 0xbbe   : > { %1441 = vst.msk [vmem:[%s396_s25] sm:$0xff] %vm488_vm0, %v1432_v26 }
 0xbbf   : > { %1794 = shalt.err (!%p1791_p4)
}
 0xbc0   : > { %1686 = dma.vmem_to_hbm [thread:$0]  (%p1929_p5), %s1469_s26, 128, %s1471_s30, %s1451_s12  }
 0xbc1 PF: > { %p1692_p7 = scmp.ge.s32.totalorder %s1829_s16, 2  ;;  %s1486_s29 = sand.u32 1, %s1817_s13  }
 0xbc2   : > { %s1487_s28 = scalar_lea.sflag [#allocation3], %s1486_s29 }
 0xbc3   : > { %p1689_p8 = pnand %p1692_p7, %p1933_p6 }
 0xbc5   : > { %p1690_p9 = pneg %p1689_p8 }
 0xbc7   : > { %1812 = dma.done.wait (%p1690_p9), %s1487_s28, 128  }
 0xbc8   : > { %1814 = vsyncadd (%p1690_p9), %s1487_s28, 4294967168  ;;  %p21_p10 = scmp.ge.s32.totalorder %s1916_s19, 4   ;;  %s2467_s13 = smov %s1821_s14 }
 0xbc9   : > { %s2468_s14 = smov %s1825_s15  ;;  %s2469_s15 = smov %s1927_s22 }
 0xbca   : > { %s2470_s16 = smov %s1916_s19  ;;  %23 = sbr.rel (!%p21_p10) target bundleno = 5 (0x5), region = 112 }
 0xbcf   :  { %1501 = vsyncpa [#allocation3], 1 }
 0xbd0   :  { %1503 = vsyncpa [#allocation3 + $0x1], 1 }

</bundles_post_ra>
